<compile_context>
chip_gen: v7x
topology: tpu7x:2x2x1
jax: 0.10.0
libtpu: 0.0.40
codegen_flags: <defaults>
</compile_context>

<pallas_src>
import jax
import jax.numpy as jnp
from jax.experimental import pallas as pl
from jax.experimental.pallas import tpu as pltpu

_VMEM_LIMIT = 32 * 1024 * 1024  # conservative: fits the scoped-VMEM default on v5e/v6e/v7x


# ----------------------------- Pallas kernels -----------------------------

def _pool_conv_stats_kernel(x_ref, w_ref, b_ref, y_ref, sum_ref, sq_ref, pad_ref):
    """Fused MaxPool2d(2) -> Conv3x3(+bias) -> BN sum/sumsq accumulation.

    x_ref  : (H2, 2, W2, 2*Cin)  one image; 2x2 window = (axis 1) x (lane halves)
    w_ref  : (9*Cin, Cmid) bf16  im2col-flattened conv weights (resident)
    b_ref  : (1, Cmid) f32
    y_ref  : (1, H2, W2, Cmid) f32  pre-BN conv output (consumed by stage 2)
    sum_ref/sq_ref : (1, Cmid) f32  accumulated across the (arbitrary) batch grid
    pad_ref: (H2+2, W2+2, Cin) f32  zero-padded pooled activation (VMEM scratch)
    """
    h2, w2 = y_ref.shape[1], y_ref.shape[2]
    cin = pad_ref.shape[2]

    @pl.when(pl.program_id(0) == 0)
    def _init():
        pad_ref[...] = jnp.zeros_like(pad_ref)   # zero border once; interior rewritten
        sum_ref[...] = jnp.zeros_like(sum_ref)
        sq_ref[...] = jnp.zeros_like(sq_ref)

    # 2x2 max-pool: H-pair max over the size-2 major axis, W-pair max over lane halves.
    m = jnp.maximum(x_ref[:, 0, :, :], x_ref[:, 1, :, :])          # (H2, W2, 2*Cin)
    pooled = jnp.maximum(m[:, :, :cin], m[:, :, cin:])             # (H2, W2, Cin)

    # SAME 3x3 conv: write pooled into the padded scratch, take 9 shifted taps,
    # concatenate along lanes (in-kernel im2col) and do ONE K=9*Cin MXU matmul.
    pad_ref[1:h2 + 1, 1:w2 + 1, :] = pooled
    taps = [pad_ref[dy:dy + h2, dx:dx + w2, :]
            for dy in range(3) for dx in range(3)]
    im2col = jnp.concatenate(taps, axis=-1).reshape(h2 * w2, 9 * cin)
    y = jnp.dot(im2col.astype(jnp.bfloat16), w_ref[...],
                preferred_element_type=jnp.float32) + b_ref[...]   # (H2*W2, Cmid) f32

    sum_ref[...] += jnp.sum(y, axis=0, keepdims=True)
    sq_ref[...] += jnp.sum(y * y, axis=0, keepdims=True)
    y_ref[0] = y.reshape(h2, w2, -1)


def _bn_relu_conv_stats_kernel(y_ref, s_ref, t_ref, w_ref, b_ref,
                               o_ref, sum_ref, sq_ref, pad_ref):
    """Fused BN(scale/shift)+ReLU -> Conv3x3(+bias) -> BN sum/sumsq accumulation."""
    h2, w2 = o_ref.shape[1], o_ref.shape[2]
    cin = pad_ref.shape[2]

    @pl.when(pl.program_id(0) == 0)
    def _init():
        pad_ref[...] = jnp.zeros_like(pad_ref)
        sum_ref[...] = jnp.zeros_like(sum_ref)
        sq_ref[...] = jnp.zeros_like(sq_ref)

    # normalize + ReLU the previous conv output (f32), then pad for the next conv
    a = jnp.maximum(y_ref[0] * s_ref[...] + t_ref[...], 0.0)       # (H2, W2, Cin)
    pad_ref[1:h2 + 1, 1:w2 + 1, :] = a
    taps = [pad_ref[dy:dy + h2, dx:dx + w2, :]
            for dy in range(3) for dx in range(3)]
    im2col = jnp.concatenate(taps, axis=-1).reshape(h2 * w2, 9 * cin)
    y = jnp.dot(im2col.astype(jnp.bfloat16), w_ref[...],
                preferred_element_type=jnp.float32) + b_ref[...]

    sum_ref[...] += jnp.sum(y, axis=0, keepdims=True)
    sq_ref[...] += jnp.sum(y * y, axis=0, keepdims=True)
    o_ref[0] = y.reshape(h2, w2, -1)


def _bn_relu_kernel(y_ref, s_ref, t_ref, o_ref):
    """Elementwise affine-normalize + ReLU (used with a lane-dense 128-wide view)."""
    o_ref[...] = jnp.maximum(y_ref[...] * s_ref[...] + t_ref[...], 0.0)


# ------------------------------- wrappers ---------------------------------

def _pool_conv_stats(x_nhwc, w_hwio, b):
    n, h, w, cin = x_nhwc.shape
    h2, w2 = h // 2, w // 2
    cmid = w_hwio.shape[-1]
    # free row-major view: (N, H, W, Cin) -> (N*H2, 2, W2, 2*Cin); no data movement
    x4 = x_nhwc.reshape(n * h2, 2, w2, 2 * cin)
    wk = w_hwio.reshape(9 * cin, cmid).astype(jnp.bfloat16)
    bk = b.reshape(1, cmid).astype(jnp.float32)
    return pl.pallas_call(
        _pool_conv_stats_kernel,
        out_shape=(jax.ShapeDtypeStruct((n, h2, w2, cmid), jnp.float32),
                   jax.ShapeDtypeStruct((1, cmid), jnp.float32),
                   jax.ShapeDtypeStruct((1, cmid), jnp.float32)),
        grid=(n,),
        in_specs=[
            pl.BlockSpec((h2, 2, w2, 2 * cin), lambda i: (i, 0, 0, 0)),
            pl.BlockSpec((9 * cin, cmid), lambda i: (0, 0)),   # weights stay resident
            pl.BlockSpec((1, cmid), lambda i: (0, 0)),
        ],
        out_specs=(
            pl.BlockSpec((1, h2, w2, cmid), lambda i: (i, 0, 0, 0)),
            pl.BlockSpec((1, cmid), lambda i: (0, 0)),
            pl.BlockSpec((1, cmid), lambda i: (0, 0)),
        ),
        scratch_shapes=[pltpu.VMEM((h2 + 2, w2 + 2, cin), jnp.float32)],
        compiler_params=pltpu.CompilerParams(
            dimension_semantics=("arbitrary",),   # stats accumulate across the batch axis
            vmem_limit_bytes=_VMEM_LIMIT),
    )(x4, wk, bk)


def _bn_relu_conv_stats(y, scale, shift, w_hwio, b):
    n, h2, w2, cmid = y.shape
    cout = w_hwio.shape[-1]
    wk = w_hwio.reshape(9 * cmid, cout).astype(jnp.bfloat16)
    bk = b.reshape(1, cout).astype(jnp.float32)
    return pl.pallas_call(
        _bn_relu_conv_stats_kernel,
        out_shape=(jax.ShapeDtypeStruct((n, h2, w2, cout), jnp.float32),
                   jax.ShapeDtypeStruct((1, cout), jnp.float32),
                   jax.ShapeDtypeStruct((1, cout), jnp.float32)),
        grid=(n,),
        in_specs=[
            pl.BlockSpec((1, h2, w2, cmid), lambda i: (i, 0, 0, 0)),
            pl.BlockSpec((1, cmid), lambda i: (0, 0)),
            pl.BlockSpec((1, cmid), lambda i: (0, 0)),
            pl.BlockSpec((9 * cmid, cout), lambda i: (0, 0)),
            pl.BlockSpec((1, cout), lambda i: (0, 0)),
        ],
        out_specs=(
            pl.BlockSpec((1, h2, w2, cout), lambda i: (i, 0, 0, 0)),
            pl.BlockSpec((1, cout), lambda i: (0, 0)),
            pl.BlockSpec((1, cout), lambda i: (0, 0)),
        ),
        scratch_shapes=[pltpu.VMEM((h2 + 2, w2 + 2, cmid), jnp.float32)],
        compiler_params=pltpu.CompilerParams(
            dimension_semantics=("arbitrary",),
            vmem_limit_bytes=_VMEM_LIMIT),
    )(y, scale.reshape(1, cmid), shift.reshape(1, cmid), wk, bk)


def _row_tile(rows):
    for t in (1024, 512, 256, 128, 64, 32, 16, 8):
        if rows % t == 0:
            return t
    return rows


def _bn_relu(y, scale, shift):
    """Final BN+ReLU. Lane-dense (rows, 128) layout when shapes allow (full-width stores)."""
    n, h2, w2, c = y.shape
    total = n * h2 * w2 * c
    if total % 128 == 0 and 128 % c == 0:
        rows = total // 128
        tr = _row_tile(rows)
        reps = 128 // c
        y_flat = y.reshape(rows, 128)                         # free row-major view
        s_flat = jnp.tile(scale.reshape(1, c), (1, reps))     # lane l -> channel l % c
        t_flat = jnp.tile(shift.reshape(1, c), (1, reps))
        out = pl.pallas_call(
            _bn_relu_kernel,
            out_shape=jax.ShapeDtypeStruct((rows, 128), jnp.float32),
            grid=(rows // tr,),
            in_specs=[pl.BlockSpec((tr, 128), lambda i: (i, 0)),
                      pl.BlockSpec((1, 128), lambda i: (0, 0)),
                      pl.BlockSpec((1, 128), lambda i: (0, 0))],
            out_specs=pl.BlockSpec((tr, 128), lambda i: (i, 0)),
            compiler_params=pltpu.CompilerParams(
                dimension_semantics=("parallel",),
                vmem_limit_bytes=_VMEM_LIMIT),
        )(y_flat, s_flat, t_flat)
        return out.reshape(n, h2, w2, c)
    # fallback: channels-last per-image blocks
    hw = h2 * w2
    out = pl.pallas_call(
        _bn_relu_kernel,
        out_shape=jax.ShapeDtypeStruct((n, hw, c), jnp.float32),
        grid=(n,),
        in_specs=[pl.BlockSpec((1, hw, c), lambda i: (i, 0, 0)),
                  pl.BlockSpec((1, c), lambda i: (0, 0)),
                  pl.BlockSpec((1, c), lambda i: (0, 0))],
        out_specs=pl.BlockSpec((1, hw, c), lambda i: (i, 0, 0)),
        compiler_params=pltpu.CompilerParams(
            dimension_semantics=("parallel",),
            vmem_limit_bytes=_VMEM_LIMIT),
    )(y.reshape(n, hw, c), scale.reshape(1, c), shift.reshape(1, c))
    return out.reshape(n, h2, w2, c)


def _bn_scale_shift(s, sq, count, gamma, beta, eps=1e-5):
    """Fold batch statistics + (gamma, beta) into a per-channel scale/shift (tiny glue)."""
    mean = s / count
    var = jnp.maximum(sq / count - mean * mean, 0.0)   # clamp cancellation-induced negatives
    scale = gamma.reshape(1, -1) / jnp.sqrt(var + eps)
    shift = beta.reshape(1, -1) - mean * scale
    return scale, shift


def down_forward(x_nchw, p):
    """Down.forward: MaxPool2d(2) -> Conv3x3 -> BN -> ReLU -> Conv3x3 -> BN -> ReLU."""
    x = jnp.transpose(x_nchw, (0, 2, 3, 1)).astype(jnp.float32)    # NCHW -> NHWC
    n, h, w, _ = x.shape
    assert h % 2 == 0 and w % 2 == 0
    h2, w2 = h // 2, w // 2
    count = n * h2 * w2

    # stage 1: pool + conv1 + bias + BN1 statistics (single pallas_call)
    y1, s1, q1 = _pool_conv_stats(x, p["w1"], p["b1"])
    scale1, shift1 = _bn_scale_shift(s1, q1, count, p["g1"], p["be1"])

    # stage 2: BN1+ReLU + conv2 + bias + BN2 statistics (single pallas_call)
    y2, s2, q2 = _bn_relu_conv_stats(y1, scale1, shift1, p["w2"], p["b2"])
    scale2, shift2 = _bn_scale_shift(s2, q2, count, p["g2"], p["be2"])

    # stage 3: BN2+ReLU (lane-dense elementwise kernel)
    out = _bn_relu(y2, scale2, shift2)
    return jnp.transpose(out, (0, 3, 1, 2))                        # NHWC -> NCHW


# --------------------------- params & reference ----------------------------

def init_down_params(key, in_ch, out_ch):
    mid = out_ch
    k = jax.random.split(key, 4)

    def conv_init(kw, kb, cin, cout):
        bound = 1.0 / (cin * 9) ** 0.5        # PyTorch default conv init bound
        w = jax.random.uniform(kw, (3, 3, cin, cout), jnp.float32, -bound, bound)
        b = jax.random.uniform(kb, (cout,), jnp.float32, -bound, bound)
        return w, b

    w1, b1 = conv_init(k[0], k[1], in_ch, mid)
    w2, b2 = conv_init(k[2], k[3], mid, out_ch)
    return dict(
        w1=w1, b1=b1, g1=jnp.ones((mid,), jnp.float32), be1=jnp.zeros((mid,), jnp.float32),
        w2=w2, b2=b2, g2=jnp.ones((out_ch,), jnp.float32), be2=jnp.zeros((out_ch,), jnp.float32),
    )


def ref_forward(x_nchw, p):
    """Pure-JAX reference mirroring the kernel's numerics (bf16 MXU inputs, f32 accum)."""
    x = jnp.transpose(x_nchw, (0, 2, 3, 1)).astype(jnp.float32)
    n, h, w, c = x.shape
    x = x.reshape(n, h // 2, 2, w // 2, 2, c).max(axis=(2, 4))

    def conv_bn_relu(x, wgt, b, g, be):
        y = jax.lax.conv_general_dilated(
            x.astype(jnp.bfloat16), wgt.astype(jnp.bfloat16), (1, 1), "SAME",
            dimension_numbers=("NHWC", "HWIO", "NHWC"),
            preferred_element_type=jnp.float32) + b
        mean = y.mean(axis=(0, 1, 2))
        var = y.var(axis=(0, 1, 2))               # biased variance (training-mode BN)
        y = (y - mean) / jnp.sqrt(var + 1e-5) * g + be
        return jnp.maximum(y, 0.0)

    x = conv_bn_relu(x, p["w1"], p["b1"], p["g1"], p["be1"])
    x = conv_bn_relu(x, p["w2"], p["b2"], p["g2"], p["be2"])
    return jnp.transpose(x, (0, 3, 1, 2))


# ---------------------------------- main -----------------------------------

if __name__ == "__main__":
    key = jax.random.PRNGKey(0)
    kx, kp = jax.random.split(key)

    N, C_IN, C_OUT, H, W = 2, 4, 8, 16, 16
    x = jax.random.normal(kx, (N, C_IN, H, W), jnp.float32)     # NCHW, like PyTorch
    params = init_down_params(kp, C_IN, C_OUT)

    out = jax.block_until_ready(jax.jit(down_forward)(x, params))
    assert out.shape == (N, C_OUT, H // 2, W // 2), out.shape

    ref = jax.block_until_ready(jax.jit(ref_forward)(x, params))
    max_err = float(jnp.max(jnp.abs(out - ref)))
    assert max_err < 2e-3, f"mismatch vs reference: {max_err}"

    print("KERNEL_OK")
</pallas_src>

<mosaic_0001>
module attributes {stable_mosaic.version = 11 : i64} {
  func.func @_pool_conv_stats_kernel(%arg0: i32, %arg1: memref<8x2x8x8xf32, #tpu.memory_space<vmem>>, %arg2: memref<36x8xbf16, #tpu.memory_space<vmem>>, %arg3: memref<1x8xf32, #tpu.memory_space<vmem>>, %arg4: memref<1x8x8x8xf32, #tpu.memory_space<vmem>>, %arg5: memref<1x8xf32, #tpu.memory_space<vmem>>, %arg6: memref<1x8xf32, #tpu.memory_space<vmem>>, %arg7: memref<10x10x4xf32, #tpu.memory_space<vmem>>) attributes {dimension_semantics = [#tpu.dimension_semantics<arbitrary>], iteration_bounds = array<i64: 2>, scalar_prefetch = 0 : i64, scratch_operands = 1 : i64, tpu.core_type = #tpu.core_type<tc>, window_params = [{transform_indices = @transform_0, window_bounds = array<i64: 8, 2, 8, 8>}, {pipeline_mode = #tpu.pipeline_mode<synchronous>, transform_indices = @transform_1, window_bounds = array<i64: 36, 8>}, {pipeline_mode = #tpu.pipeline_mode<synchronous>, transform_indices = @transform_2, window_bounds = array<i64: 1, 8>}, {transform_indices = @transform_3, window_bounds = array<i64: 1, 8, 8, 8>}, {pipeline_mode = #tpu.pipeline_mode<synchronous>, transform_indices = @transform_4, window_bounds = array<i64: 1, 8>}, {pipeline_mode = #tpu.pipeline_mode<synchronous>, transform_indices = @transform_5, window_bounds = array<i64: 1, 8>}]} {
    %c0_i32 = arith.constant 0 : i32
    %0 = arith.cmpi eq, %arg0, %c0_i32 : i32
    %1 = arith.extui %0 : i1 to i32
    %c0_i32_0 = arith.constant 0 : i32
    %2 = arith.cmpi ne, %1, %c0_i32_0 : i32
    scf.if %2 {
      %cst_54 = arith.constant 0.000000e+00 : f32
      %44 = vector.broadcast %cst_54 : f32 to vector<10x10x4xf32>
      %c0_55 = arith.constant 0 : index
      %c0_56 = arith.constant 0 : index
      %c0_57 = arith.constant 0 : index
      %45 = vector.load %arg7[%c0_55, %c0_56, %c0_57] : memref<10x10x4xf32, #tpu.memory_space<vmem>>, vector<10x10x4xf32>
      tpu.vector_store %arg7[%c0_55, %c0_56, %c0_57], %44 {strides = array<i32>} : memref<10x10x4xf32, #tpu.memory_space<vmem>>, vector<10x10x4xf32>,
      %cst_58 = arith.constant 0.000000e+00 : f32
      %46 = vector.broadcast %cst_58 : f32 to vector<1x8xf32>
      %c0_59 = arith.constant 0 : index
      %c0_60 = arith.constant 0 : index
      %47 = vector.load %arg5[%c0_59, %c0_60] : memref<1x8xf32, #tpu.memory_space<vmem>>, vector<1x8xf32>
      tpu.vector_store %arg5[%c0_59, %c0_60], %46 {strides = array<i32>} : memref<1x8xf32, #tpu.memory_space<vmem>>, vector<1x8xf32>,
      %cst_61 = arith.constant 0.000000e+00 : f32
      %48 = vector.broadcast %cst_61 : f32 to vector<1x8xf32>
      %c0_62 = arith.constant 0 : index
      %c0_63 = arith.constant 0 : index
      %49 = vector.load %arg6[%c0_62, %c0_63] : memref<1x8xf32, #tpu.memory_space<vmem>>, vector<1x8xf32>
      tpu.vector_store %arg6[%c0_62, %c0_63], %48 {strides = array<i32>} : memref<1x8xf32, #tpu.memory_space<vmem>>, vector<1x8xf32>,
    } else {
    }
    %c0 = arith.constant 0 : index
    %c0_1 = arith.constant 0 : index
    %c0_2 = arith.constant 0 : index
    %c0_3 = arith.constant 0 : index
    %3 = vector.load %arg1[%c0, %c0_1, %c0_2, %c0_3] : memref<8x2x8x8xf32, #tpu.memory_space<vmem>>, vector<8x1x8x8xf32>
    %4 = vector.shape_cast %3 : vector<8x1x8x8xf32> to vector<8x8x8xf32>
    %c0_4 = arith.constant 0 : index
    %c1 = arith.constant 1 : index
    %c0_5 = arith.constant 0 : index
    %c0_6 = arith.constant 0 : index
    %5 = vector.load %arg1[%c0_4, %c1, %c0_5, %c0_6] : memref<8x2x8x8xf32, #tpu.memory_space<vmem>>, vector<8x1x8x8xf32>
    %6 = vector.shape_cast %5 : vector<8x1x8x8xf32> to vector<8x8x8xf32>
    %7 = arith.maximumf %4, %6 : vector<8x8x8xf32>
    %8 = vector.extract_strided_slice %7 {offsets = [0, 0, 0], sizes = [8, 8, 4], strides = [1, 1, 1]} : vector<8x8x8xf32> to vector<8x8x4xf32>
    %9 = vector.extract_strided_slice %7 {offsets = [0, 0, 4], sizes = [8, 8, 4], strides = [1, 1, 1]} : vector<8x8x8xf32> to vector<8x8x4xf32>
    %10 = arith.maximumf %8, %9 : vector<8x8x4xf32>
    %c1_7 = arith.constant 1 : index
    %c1_8 = arith.constant 1 : index
    %c0_9 = arith.constant 0 : index
    %11 = vector.load %arg7[%c1_7, %c1_8, %c0_9] : memref<10x10x4xf32, #tpu.memory_space<vmem>>, vector<8x8x4xf32>
    tpu.vector_store %arg7[%c1_7, %c1_8, %c0_9], %10 {strides = array<i32>} : memref<10x10x4xf32, #tpu.memory_space<vmem>>, vector<8x8x4xf32>,
    %c0_10 = arith.constant 0 : index
    %c0_11 = arith.constant 0 : index
    %c0_12 = arith.constant 0 : index
    %12 = vector.load %arg7[%c0_10, %c0_11, %c0_12] : memref<10x10x4xf32, #tpu.memory_space<vmem>>, vector<8x8x4xf32>
    %c0_13 = arith.constant 0 : index
    %c1_14 = arith.constant 1 : index
    %c0_15 = arith.constant 0 : index
    %13 = vector.load %arg7[%c0_13, %c1_14, %c0_15] : memref<10x10x4xf32, #tpu.memory_space<vmem>>, vector<8x8x4xf32>
    %c0_16 = arith.constant 0 : index
    %c2 = arith.constant 2 : index
    %c0_17 = arith.constant 0 : index
    %14 = vector.load %arg7[%c0_16, %c2, %c0_17] : memref<10x10x4xf32, #tpu.memory_space<vmem>>, vector<8x8x4xf32>
    %c1_18 = arith.constant 1 : index
    %c0_19 = arith.constant 0 : index
    %c0_20 = arith.constant 0 : index
    %15 = vector.load %arg7[%c1_18, %c0_19, %c0_20] : memref<10x10x4xf32, #tpu.memory_space<vmem>>, vector<8x8x4xf32>
    %c1_21 = arith.constant 1 : index
    %c1_22 = arith.constant 1 : index
    %c0_23 = arith.constant 0 : index
    %16 = vector.load %arg7[%c1_21, %c1_22, %c0_23] : memref<10x10x4xf32, #tpu.memory_space<vmem>>, vector<8x8x4xf32>
    %c1_24 = arith.constant 1 : index
    %c2_25 = arith.constant 2 : index
    %c0_26 = arith.constant 0 : index
    %17 = vector.load %arg7[%c1_24, %c2_25, %c0_26] : memref<10x10x4xf32, #tpu.memory_space<vmem>>, vector<8x8x4xf32>
    %c2_27 = arith.constant 2 : index
    %c0_28 = arith.constant 0 : index
    %c0_29 = arith.constant 0 : index
    %18 = vector.load %arg7[%c2_27, %c0_28, %c0_29] : memref<10x10x4xf32, #tpu.memory_space<vmem>>, vector<8x8x4xf32>
    %c2_30 = arith.constant 2 : index
    %c1_31 = arith.constant 1 : index
    %c0_32 = arith.constant 0 : index
    %19 = vector.load %arg7[%c2_30, %c1_31, %c0_32] : memref<10x10x4xf32, #tpu.memory_space<vmem>>, vector<8x8x4xf32>
    %c2_33 = arith.constant 2 : index
    %c2_34 = arith.constant 2 : index
    %c0_35 = arith.constant 0 : index
    %20 = vector.load %arg7[%c2_33, %c2_34, %c0_35] : memref<10x10x4xf32, #tpu.memory_space<vmem>>, vector<8x8x4xf32>
    %21 = tpu.concatenate %12, %13, %14, %15, %16, %17, %18, %19, %20 in 2 : vector<8x8x4xf32>, vector<8x8x4xf32>, vector<8x8x4xf32>, vector<8x8x4xf32>, vector<8x8x4xf32>, vector<8x8x4xf32>, vector<8x8x4xf32>, vector<8x8x4xf32>, vector<8x8x4xf32> -> vector<8x8x36xf32>
    %22 = vector.shape_cast %21 : vector<8x8x36xf32> to vector<64x36xf32>
    %23 = arith.truncf %22 : vector<64x36xf32> to vector<64x36xbf16>
    %c0_36 = arith.constant 0 : index
    %c0_37 = arith.constant 0 : index
    %24 = vector.load %arg2[%c0_36, %c0_37] : memref<36x8xbf16, #tpu.memory_space<vmem>>, vector<36x8xbf16>
    %cst = arith.constant dense<0.000000e+00> : vector<64x8xf32>
    %25 = tpu.matmul %23, %24, %cst {dimension_numbers = #tpu.dot_dimension_numbers<[1], [0], [0], [1], [0, 0, 1, 1], [], []>} : vector<64x36xbf16>, vector<36x8xbf16>, vector<64x8xf32> -> vector<64x8xf32>
    %c0_38 = arith.constant 0 : index
    %c0_39 = arith.constant 0 : index
    %26 = vector.load %arg3[%c0_38, %c0_39] : memref<1x8xf32, #tpu.memory_space<vmem>>, vector<1x8xf32>
    %27 = vector.broadcast %26 : vector<1x8xf32> to vector<64x8xf32>
    %28 = arith.addf %25, %27 : vector<64x8xf32>
    %c0_40 = arith.constant 0 : index
    %c0_41 = arith.constant 0 : index
    %29 = vector.load %arg5[%c0_40, %c0_41] : memref<1x8xf32, #tpu.memory_space<vmem>>, vector<1x8xf32>
    %cst_42 = arith.constant dense<0.000000e+00> : vector<8xf32>
    %30 = vector.multi_reduction <add>, %28, %cst_42 [0] : vector<64x8xf32> to vector<8xf32>
    %31 = vector.shape_cast %30 : vector<8xf32> to vector<1x8xf32>
    %32 = arith.addf %29, %31 : vector<1x8xf32>
    %c0_43 = arith.constant 0 : index
    %c0_44 = arith.constant 0 : index
    %33 = vector.load %arg5[%c0_43, %c0_44] : memref<1x8xf32, #tpu.memory_space<vmem>>, vector<1x8xf32>
    tpu.vector_store %arg5[%c0_43, %c0_44], %32 {strides = array<i32>} : memref<1x8xf32, #tpu.memory_space<vmem>>, vector<1x8xf32>,
    %c0_45 = arith.constant 0 : index
    %c0_46 = arith.constant 0 : index
    %34 = vector.load %arg6[%c0_45, %c0_46] : memref<1x8xf32, #tpu.memory_space<vmem>>, vector<1x8xf32>
    %35 = arith.mulf %28, %28 : vector<64x8xf32>
    %cst_47 = arith.constant dense<0.000000e+00> : vector<8xf32>
    %36 = vector.multi_reduction <add>, %35, %cst_47 [0] : vector<64x8xf32> to vector<8xf32>
    %37 = vector.shape_cast %36 : vector<8xf32> to vector<1x8xf32>
    %38 = arith.addf %34, %37 : vector<1x8xf32>
    %c0_48 = arith.constant 0 : index
    %c0_49 = arith.constant 0 : index
    %39 = vector.load %arg6[%c0_48, %c0_49] : memref<1x8xf32, #tpu.memory_space<vmem>>, vector<1x8xf32>
    tpu.vector_store %arg6[%c0_48, %c0_49], %38 {strides = array<i32>} : memref<1x8xf32, #tpu.memory_space<vmem>>, vector<1x8xf32>,
    %40 = vector.shape_cast %28 : vector<64x8xf32> to vector<8x8x8xf32>
    %c0_50 = arith.constant 0 : index
    %c0_51 = arith.constant 0 : index
    %c0_52 = arith.constant 0 : index
    %c0_53 = arith.constant 0 : index
    %41 = vector.load %arg4[%c0_50, %c0_51, %c0_52, %c0_53] : memref<1x8x8x8xf32, #tpu.memory_space<vmem>>, vector<1x8x8x8xf32>
    %42 = vector.shape_cast %41 : vector<1x8x8x8xf32> to vector<8x8x8xf32>
    %43 = vector.shape_cast %40 : vector<8x8x8xf32> to vector<1x8x8x8xf32>
    tpu.vector_store %arg4[%c0_50, %c0_51, %c0_52, %c0_53], %43 {strides = array<i32>} : memref<1x8x8x8xf32, #tpu.memory_space<vmem>>, vector<1x8x8x8xf32>,
    return
  }
  func.func @transform_0(%arg0: i32) -> (i32, i32, i32, i32) {
    %c0_i32 = arith.constant 0 : i32
    %c0_i32_0 = arith.constant 0 : i32
    %c0_i32_1 = arith.constant 0 : i32
    %c0_i32_2 = arith.constant 0 : i32
    return %arg0, %c0_i32, %c0_i32_0, %c0_i32_1 : i32, i32, i32, i32
  }
  func.func @transform_1(%arg0: i32) -> (i32, i32) {
    %c0_i32 = arith.constant 0 : i32
    %c0_i32_0 = arith.constant 0 : i32
    %c0_i32_1 = arith.constant 0 : i32
    return %c0_i32, %c0_i32_0 : i32, i32
  }
  func.func @transform_2(%arg0: i32) -> (i32, i32) {
    %c0_i32 = arith.constant 0 : i32
    %c0_i32_0 = arith.constant 0 : i32
    %c0_i32_1 = arith.constant 0 : i32
    return %c0_i32, %c0_i32_0 : i32, i32
  }
  func.func @transform_3(%arg0: i32) -> (i32, i32, i32, i32) {
    %c0_i32 = arith.constant 0 : i32
    %c0_i32_0 = arith.constant 0 : i32
    %c0_i32_1 = arith.constant 0 : i32
    %c0_i32_2 = arith.constant 0 : i32
    return %arg0, %c0_i32, %c0_i32_0, %c0_i32_1 : i32, i32, i32, i32
  }
  func.func @transform_4(%arg0: i32) -> (i32, i32) {
    %c0_i32 = arith.constant 0 : i32
    %c0_i32_0 = arith.constant 0 : i32
    %c0_i32_1 = arith.constant 0 : i32
    return %c0_i32, %c0_i32_0 : i32, i32
  }
  func.func @transform_5(%arg0: i32) -> (i32, i32) {
    %c0_i32 = arith.constant 0 : i32
    %c0_i32_0 = arith.constant 0 : i32
    %c0_i32_1 = arith.constant 0 : i32
    return %c0_i32, %c0_i32_0 : i32, i32
  }
}

module attributes {stable_mosaic.version = 11 : i64} {
  func.func @_bn_relu_conv_stats_kernel(%arg0: i32, %arg1: memref<1x8x8x8xf32, #tpu.memory_space<vmem>>, %arg2: memref<1x8xf32, #tpu.memory_space<vmem>>, %arg3: memref<1x8xf32, #tpu.memory_space<vmem>>, %arg4: memref<72x8xbf16, #tpu.memory_space<vmem>>, %arg5: memref<1x8xf32, #tpu.memory_space<vmem>>, %arg6: memref<1x8x8x8xf32, #tpu.memory_space<vmem>>, %arg7: memref<1x8xf32, #tpu.memory_space<vmem>>, %arg8: memref<1x8xf32, #tpu.memory_space<vmem>>, %arg9: memref<10x10x8xf32, #tpu.memory_space<vmem>>) attributes {dimension_semantics = [#tpu.dimension_semantics<arbitrary>], iteration_bounds = array<i64: 2>, scalar_prefetch = 0 : i64, scratch_operands = 1 : i64, tpu.core_type = #tpu.core_type<tc>, window_params = [{transform_indices = @transform_0, window_bounds = array<i64: 1, 8, 8, 8>}, {pipeline_mode = #tpu.pipeline_mode<synchronous>, transform_indices = @transform_1, window_bounds = array<i64: 1, 8>}, {pipeline_mode = #tpu.pipeline_mode<synchronous>, transform_indices = @transform_2, window_bounds = array<i64: 1, 8>}, {pipeline_mode = #tpu.pipeline_mode<synchronous>, transform_indices = @transform_3, window_bounds = array<i64: 72, 8>}, {pipeline_mode = #tpu.pipeline_mode<synchronous>, transform_indices = @transform_4, window_bounds = array<i64: 1, 8>}, {transform_indices = @transform_5, window_bounds = array<i64: 1, 8, 8, 8>}, {pipeline_mode = #tpu.pipeline_mode<synchronous>, transform_indices = @transform_6, window_bounds = array<i64: 1, 8>}, {pipeline_mode = #tpu.pipeline_mode<synchronous>, transform_indices = @transform_7, window_bounds = array<i64: 1, 8>}]} {
    %c0_i32 = arith.constant 0 : i32
    %0 = arith.cmpi eq, %arg0, %c0_i32 : i32
    %1 = arith.extui %0 : i1 to i32
    %c0_i32_0 = arith.constant 0 : i32
    %2 = arith.cmpi ne, %1, %c0_i32_0 : i32
    scf.if %2 {
      %cst_55 = arith.constant 0.000000e+00 : f32
      %48 = vector.broadcast %cst_55 : f32 to vector<10x10x8xf32>
      %c0_56 = arith.constant 0 : index
      %c0_57 = arith.constant 0 : index
      %c0_58 = arith.constant 0 : index
      %49 = vector.load %arg9[%c0_56, %c0_57, %c0_58] : memref<10x10x8xf32, #tpu.memory_space<vmem>>, vector<10x10x8xf32>
      tpu.vector_store %arg9[%c0_56, %c0_57, %c0_58], %48 {strides = array<i32>} : memref<10x10x8xf32, #tpu.memory_space<vmem>>, vector<10x10x8xf32>,
      %cst_59 = arith.constant 0.000000e+00 : f32
      %50 = vector.broadcast %cst_59 : f32 to vector<1x8xf32>
      %c0_60 = arith.constant 0 : index
      %c0_61 = arith.constant 0 : index
      %51 = vector.load %arg7[%c0_60, %c0_61] : memref<1x8xf32, #tpu.memory_space<vmem>>, vector<1x8xf32>
      tpu.vector_store %arg7[%c0_60, %c0_61], %50 {strides = array<i32>} : memref<1x8xf32, #tpu.memory_space<vmem>>, vector<1x8xf32>,
      %cst_62 = arith.constant 0.000000e+00 : f32
      %52 = vector.broadcast %cst_62 : f32 to vector<1x8xf32>
      %c0_63 = arith.constant 0 : index
      %c0_64 = arith.constant 0 : index
      %53 = vector.load %arg8[%c0_63, %c0_64] : memref<1x8xf32, #tpu.memory_space<vmem>>, vector<1x8xf32>
      tpu.vector_store %arg8[%c0_63, %c0_64], %52 {strides = array<i32>} : memref<1x8xf32, #tpu.memory_space<vmem>>, vector<1x8xf32>,
    } else {
    }
    %c0 = arith.constant 0 : index
    %c0_1 = arith.constant 0 : index
    %c0_2 = arith.constant 0 : index
    %c0_3 = arith.constant 0 : index
    %3 = vector.load %arg1[%c0, %c0_1, %c0_2, %c0_3] : memref<1x8x8x8xf32, #tpu.memory_space<vmem>>, vector<1x8x8x8xf32>
    %4 = vector.shape_cast %3 : vector<1x8x8x8xf32> to vector<8x8x8xf32>
    %c0_4 = arith.constant 0 : index
    %c0_5 = arith.constant 0 : index
    %5 = vector.load %arg2[%c0_4, %c0_5] : memref<1x8xf32, #tpu.memory_space<vmem>>, vector<1x8xf32>
    %6 = vector.shape_cast %5 : vector<1x8xf32> to vector<1x1x8xf32>
    %7 = vector.broadcast %6 : vector<1x1x8xf32> to vector<8x8x8xf32>
    %8 = arith.mulf %4, %7 : vector<8x8x8xf32>
    %c0_6 = arith.constant 0 : index
    %c0_7 = arith.constant 0 : index
    %9 = vector.load %arg3[%c0_6, %c0_7] : memref<1x8xf32, #tpu.memory_space<vmem>>, vector<1x8xf32>
    %10 = vector.shape_cast %9 : vector<1x8xf32> to vector<1x1x8xf32>
    %11 = vector.broadcast %10 : vector<1x1x8xf32> to vector<8x8x8xf32>
    %12 = arith.addf %8, %11 : vector<8x8x8xf32>
    %cst = arith.constant 0.000000e+00 : f32
    %13 = vector.broadcast %cst : f32 to vector<8x8x8xf32>
    %14 = arith.maximumf %12, %13 : vector<8x8x8xf32>
    %c1 = arith.constant 1 : index
    %c1_8 = arith.constant 1 : index
    %c0_9 = arith.constant 0 : index
    %15 = vector.load %arg9[%c1, %c1_8, %c0_9] : memref<10x10x8xf32, #tpu.memory_space<vmem>>, vector<8x8x8xf32>
    tpu.vector_store %arg9[%c1, %c1_8, %c0_9], %14 {strides = array<i32>} : memref<10x10x8xf32, #tpu.memory_space<vmem>>, vector<8x8x8xf32>,
    %c0_10 = arith.constant 0 : index
    %c0_11 = arith.constant 0 : index
    %c0_12 = arith.constant 0 : index
    %16 = vector.load %arg9[%c0_10, %c0_11, %c0_12] : memref<10x10x8xf32, #tpu.memory_space<vmem>>, vector<8x8x8xf32>
    %c0_13 = arith.constant 0 : index
    %c1_14 = arith.constant 1 : index
    %c0_15 = arith.constant 0 : index
    %17 = vector.load %arg9[%c0_13, %c1_14, %c0_15] : memref<10x10x8xf32, #tpu.memory_space<vmem>>, vector<8x8x8xf32>
    %c0_16 = arith.constant 0 : index
    %c2 = arith.constant 2 : index
    %c0_17 = arith.constant 0 : index
    %18 = vector.load %arg9[%c0_16, %c2, %c0_17] : memref<10x10x8xf32, #tpu.memory_space<vmem>>, vector<8x8x8xf32>
    %c1_18 = arith.constant 1 : index
    %c0_19 = arith.constant 0 : index
    %c0_20 = arith.constant 0 : index
    %19 = vector.load %arg9[%c1_18, %c0_19, %c0_20] : memref<10x10x8xf32, #tpu.memory_space<vmem>>, vector<8x8x8xf32>
    %c1_21 = arith.constant 1 : index
    %c1_22 = arith.constant 1 : index
    %c0_23 = arith.constant 0 : index
    %20 = vector.load %arg9[%c1_21, %c1_22, %c0_23] : memref<10x10x8xf32, #tpu.memory_space<vmem>>, vector<8x8x8xf32>
    %c1_24 = arith.constant 1 : index
    %c2_25 = arith.constant 2 : index
    %c0_26 = arith.constant 0 : index
    %21 = vector.load %arg9[%c1_24, %c2_25, %c0_26] : memref<10x10x8xf32, #tpu.memory_space<vmem>>, vector<8x8x8xf32>
    %c2_27 = arith.constant 2 : index
    %c0_28 = arith.constant 0 : index
    %c0_29 = arith.constant 0 : index
    %22 = vector.load %arg9[%c2_27, %c0_28, %c0_29] : memref<10x10x8xf32, #tpu.memory_space<vmem>>, vector<8x8x8xf32>
    %c2_30 = arith.constant 2 : index
    %c1_31 = arith.constant 1 : index
    %c0_32 = arith.constant 0 : index
    %23 = vector.load %arg9[%c2_30, %c1_31, %c0_32] : memref<10x10x8xf32, #tpu.memory_space<vmem>>, vector<8x8x8xf32>
    %c2_33 = arith.constant 2 : index
    %c2_34 = arith.constant 2 : index
    %c0_35 = arith.constant 0 : index
    %24 = vector.load %arg9[%c2_33, %c2_34, %c0_35] : memref<10x10x8xf32, #tpu.memory_space<vmem>>, vector<8x8x8xf32>
    %25 = tpu.concatenate %16, %17, %18, %19, %20, %21, %22, %23, %24 in 2 : vector<8x8x8xf32>, vector<8x8x8xf32>, vector<8x8x8xf32>, vector<8x8x8xf32>, vector<8x8x8xf32>, vector<8x8x8xf32>, vector<8x8x8xf32>, vector<8x8x8xf32>, vector<8x8x8xf32> -> vector<8x8x72xf32>
    %26 = vector.shape_cast %25 : vector<8x8x72xf32> to vector<64x72xf32>
    %27 = arith.truncf %26 : vector<64x72xf32> to vector<64x72xbf16>
    %c0_36 = arith.constant 0 : index
    %c0_37 = arith.constant 0 : index
    %28 = vector.load %arg4[%c0_36, %c0_37] : memref<72x8xbf16, #tpu.memory_space<vmem>>, vector<72x8xbf16>
    %cst_38 = arith.constant dense<0.000000e+00> : vector<64x8xf32>
    %29 = tpu.matmul %27, %28, %cst_38 {dimension_numbers = #tpu.dot_dimension_numbers<[1], [0], [0], [1], [0, 0, 1, 1], [], []>} : vector<64x72xbf16>, vector<72x8xbf16>, vector<64x8xf32> -> vector<64x8xf32>
    %c0_39 = arith.constant 0 : index
    %c0_40 = arith.constant 0 : index
    %30 = vector.load %arg5[%c0_39, %c0_40] : memref<1x8xf32, #tpu.memory_space<vmem>>, vector<1x8xf32>
    %31 = vector.broadcast %30 : vector<1x8xf32> to vector<64x8xf32>
    %32 = arith.addf %29, %31 : vector<64x8xf32>
    %c0_41 = arith.constant 0 : index
    %c0_42 = arith.constant 0 : index
    %33 = vector.load %arg7[%c0_41, %c0_42] : memref<1x8xf32, #tpu.memory_space<vmem>>, vector<1x8xf32>
    %cst_43 = arith.constant dense<0.000000e+00> : vector<8xf32>
    %34 = vector.multi_reduction <add>, %32, %cst_43 [0] : vector<64x8xf32> to vector<8xf32>
    %35 = vector.shape_cast %34 : vector<8xf32> to vector<1x8xf32>
    %36 = arith.addf %33, %35 : vector<1x8xf32>
    %c0_44 = arith.constant 0 : index
    %c0_45 = arith.constant 0 : index
    %37 = vector.load %arg7[%c0_44, %c0_45] : memref<1x8xf32, #tpu.memory_space<vmem>>, vector<1x8xf32>
    tpu.vector_store %arg7[%c0_44, %c0_45], %36 {strides = array<i32>} : memref<1x8xf32, #tpu.memory_space<vmem>>, vector<1x8xf32>,
    %c0_46 = arith.constant 0 : index
    %c0_47 = arith.constant 0 : index
    %38 = vector.load %arg8[%c0_46, %c0_47] : memref<1x8xf32, #tpu.memory_space<vmem>>, vector<1x8xf32>
    %39 = arith.mulf %32, %32 : vector<64x8xf32>
    %cst_48 = arith.constant dense<0.000000e+00> : vector<8xf32>
    %40 = vector.multi_reduction <add>, %39, %cst_48 [0] : vector<64x8xf32> to vector<8xf32>
    %41 = vector.shape_cast %40 : vector<8xf32> to vector<1x8xf32>
    %42 = arith.addf %38, %41 : vector<1x8xf32>
    %c0_49 = arith.constant 0 : index
    %c0_50 = arith.constant 0 : index
    %43 = vector.load %arg8[%c0_49, %c0_50] : memref<1x8xf32, #tpu.memory_space<vmem>>, vector<1x8xf32>
    tpu.vector_store %arg8[%c0_49, %c0_50], %42 {strides = array<i32>} : memref<1x8xf32, #tpu.memory_space<vmem>>, vector<1x8xf32>,
    %44 = vector.shape_cast %32 : vector<64x8xf32> to vector<8x8x8xf32>
    %c0_51 = arith.constant 0 : index
    %c0_52 = arith.constant 0 : index
    %c0_53 = arith.constant 0 : index
    %c0_54 = arith.constant 0 : index
    %45 = vector.load %arg6[%c0_51, %c0_52, %c0_53, %c0_54] : memref<1x8x8x8xf32, #tpu.memory_space<vmem>>, vector<1x8x8x8xf32>
    %46 = vector.shape_cast %45 : vector<1x8x8x8xf32> to vector<8x8x8xf32>
    %47 = vector.shape_cast %44 : vector<8x8x8xf32> to vector<1x8x8x8xf32>
    tpu.vector_store %arg6[%c0_51, %c0_52, %c0_53, %c0_54], %47 {strides = array<i32>} : memref<1x8x8x8xf32, #tpu.memory_space<vmem>>, vector<1x8x8x8xf32>,
    return
  }
  func.func @transform_0(%arg0: i32) -> (i32, i32, i32, i32) {
    %c0_i32 = arith.constant 0 : i32
    %c0_i32_0 = arith.constant 0 : i32
    %c0_i32_1 = arith.constant 0 : i32
    %c0_i32_2 = arith.constant 0 : i32
    return %arg0, %c0_i32, %c0_i32_0, %c0_i32_1 : i32, i32, i32, i32
  }
  func.func @transform_1(%arg0: i32) -> (i32, i32) {
    %c0_i32 = arith.constant 0 : i32
    %c0_i32_0 = arith.constant 0 : i32
    %c0_i32_1 = arith.constant 0 : i32
    return %c0_i32, %c0_i32_0 : i32, i32
  }
  func.func @transform_2(%arg0: i32) -> (i32, i32) {
    %c0_i32 = arith.constant 0 : i32
    %c0_i32_0 = arith.constant 0 : i32
    %c0_i32_1 = arith.constant 0 : i32
    return %c0_i32, %c0_i32_0 : i32, i32
  }
  func.func @transform_3(%arg0: i32) -> (i32, i32) {
    %c0_i32 = arith.constant 0 : i32
    %c0_i32_0 = arith.constant 0 : i32
    %c0_i32_1 = arith.constant 0 : i32
    return %c0_i32, %c0_i32_0 : i32, i32
  }
  func.func @transform_4(%arg0: i32) -> (i32, i32) {
    %c0_i32 = arith.constant 0 : i32
    %c0_i32_0 = arith.constant 0 : i32
    %c0_i32_1 = arith.constant 0 : i32
    return %c0_i32, %c0_i32_0 : i32, i32
  }
  func.func @transform_5(%arg0: i32) -> (i32, i32, i32, i32) {
    %c0_i32 = arith.constant 0 : i32
    %c0_i32_0 = arith.constant 0 : i32
    %c0_i32_1 = arith.constant 0 : i32
    %c0_i32_2 = arith.constant 0 : i32
    return %arg0, %c0_i32, %c0_i32_0, %c0_i32_1 : i32, i32, i32, i32
  }
  func.func @transform_6(%arg0: i32) -> (i32, i32) {
    %c0_i32 = arith.constant 0 : i32
    %c0_i32_0 = arith.constant 0 : i32
    %c0_i32_1 = arith.constant 0 : i32
    return %c0_i32, %c0_i32_0 : i32, i32
  }
  func.func @transform_7(%arg0: i32) -> (i32, i32) {
    %c0_i32 = arith.constant 0 : i32
    %c0_i32_0 = arith.constant 0 : i32
    %c0_i32_1 = arith.constant 0 : i32
    return %c0_i32, %c0_i32_0 : i32, i32
  }
}

module attributes {stable_mosaic.version = 11 : i64} {
  func.func @_bn_relu_kernel(%arg0: i32, %arg1: memref<8x128xf32, #tpu.memory_space<vmem>>, %arg2: memref<1x128xf32, #tpu.memory_space<vmem>>, %arg3: memref<1x128xf32, #tpu.memory_space<vmem>>, %arg4: memref<8x128xf32, #tpu.memory_space<vmem>>) attributes {dimension_semantics = [#tpu.dimension_semantics<parallel>], iteration_bounds = array<i64: 1>, scalar_prefetch = 0 : i64, scratch_operands = 0 : i64, tpu.core_type = #tpu.core_type<tc>, window_params = [{transform_indices = @transform_0, window_bounds = array<i64: 8, 128>}, {pipeline_mode = #tpu.pipeline_mode<synchronous>, transform_indices = @transform_1, window_bounds = array<i64: 1, 128>}, {pipeline_mode = #tpu.pipeline_mode<synchronous>, transform_indices = @transform_2, window_bounds = array<i64: 1, 128>}, {transform_indices = @transform_3, window_bounds = array<i64: 8, 128>}]} {
    %c0 = arith.constant 0 : index
    %c0_0 = arith.constant 0 : index
    %0 = vector.load %arg1[%c0, %c0_0] : memref<8x128xf32, #tpu.memory_space<vmem>>, vector<8x128xf32>
    %c0_1 = arith.constant 0 : index
    %c0_2 = arith.constant 0 : index
    %1 = vector.load %arg2[%c0_1, %c0_2] : memref<1x128xf32, #tpu.memory_space<vmem>>, vector<1x128xf32>
    %2 = vector.broadcast %1 : vector<1x128xf32> to vector<8x128xf32>
    %3 = arith.mulf %0, %2 : vector<8x128xf32>
    %c0_3 = arith.constant 0 : index
    %c0_4 = arith.constant 0 : index
    %4 = vector.load %arg3[%c0_3, %c0_4] : memref<1x128xf32, #tpu.memory_space<vmem>>, vector<1x128xf32>
    %5 = vector.broadcast %4 : vector<1x128xf32> to vector<8x128xf32>
    %6 = arith.addf %3, %5 : vector<8x128xf32>
    %cst = arith.constant 0.000000e+00 : f32
    %7 = vector.broadcast %cst : f32 to vector<8x128xf32>
    %8 = arith.maximumf %6, %7 : vector<8x128xf32>
    %c0_5 = arith.constant 0 : index
    %c0_6 = arith.constant 0 : index
    %9 = vector.load %arg4[%c0_5, %c0_6] : memref<8x128xf32, #tpu.memory_space<vmem>>, vector<8x128xf32>
    tpu.vector_store %arg4[%c0_5, %c0_6], %8 {strides = array<i32>} : memref<8x128xf32, #tpu.memory_space<vmem>>, vector<8x128xf32>,
    return
  }
  func.func @transform_0(%arg0: i32) -> (i32, i32) {
    %c0_i32 = arith.constant 0 : i32
    %c0_i32_0 = arith.constant 0 : i32
    return %arg0, %c0_i32 : i32, i32
  }
  func.func @transform_1(%arg0: i32) -> (i32, i32) {
    %c0_i32 = arith.constant 0 : i32
    %c0_i32_0 = arith.constant 0 : i32
    %c0_i32_1 = arith.constant 0 : i32
    return %c0_i32, %c0_i32_0 : i32, i32
  }
  func.func @transform_2(%arg0: i32) -> (i32, i32) {
    %c0_i32 = arith.constant 0 : i32
    %c0_i32_0 = arith.constant 0 : i32
    %c0_i32_1 = arith.constant 0 : i32
    return %c0_i32, %c0_i32_0 : i32, i32
  }
  func.func @transform_3(%arg0: i32) -> (i32, i32) {
    %c0_i32 = arith.constant 0 : i32
    %c0_i32_0 = arith.constant 0 : i32
    return %arg0, %c0_i32 : i32, i32
  }
}

</mosaic_0001>

<bundles_post_ra>
// kernel: down_forward.5
= control target key start
LH: loop header
LB: loop body
LE: loop exit
PB: predicated region body
PF: predicated region fallthrough
CT: control target
= control target key end

     0   :  { %s71_s0 = inlined_call_operand.vmem [shape: f32[8,128], index: 0, kind: input, shape index: {}]   ;;  %s72_s1 = inlined_call_operand.vmem [shape: f32[1,128], index: 1, kind: input, shape index: {}]   ;;  %s73_s2 = inlined_call_operand.vmem [shape: f32[1,128], index: 2, kind: input, shape index: {}]   ;;  %s74_s3 = inlined_call_operand.vmem [shape: f32[8,128], index: 3, kind: output, shape index: {}]  }
   0x1   :  { %v14_v0 = vld [vmem:[%s71_s0] sm:$0xff] }
   0x2   :  { %v37_v1 = vld [vmem:[%s72_s1] ss:$0 sm:$0xff] }
   0x3   :  { %v38_v2 = vld [vmem:[%s73_s2] ss:$0 sm:$0xff]  ;;  %v22_v3 = vmul.f32 %v37_v1, %v14_v0 }
   0x5   :  { %v30_v4 = vadd.f32 %v38_v2, %v22_v3 }
   0x7   :  { %v31_v5 = vmax.f32 %v30_v4, 0.0 }
   0x9   :  { %32 = vst [vmem:[%s74_s3] sm:$0xff] %v31_v5 }

// kernel: down_forward.3
= control target key start
LH: loop header
LB: loop body
LE: loop exit
PB: predicated region body
PF: predicated region fallthrough
CT: control target
= control target key end

     0   :  { %s1264_s18 = smov 0   ;;  %s1521_s0 = inlined_call_operand.vmem [shape: f32[16,2,8,8], index: 0, kind: input, shape index: {}]   ;;  %s1522_s1 = inlined_call_operand.vmem [shape: bf16[36,8], index: 1, kind: input, shape index: {}]   ;;  %s1523_s2 = inlined_call_operand.vmem [shape: f32[1,8], index: 2, kind: input, shape index: {}]   ;;  %s1524_s3 = inlined_call_operand.vmem [shape: f32[2,8,8,8], index: 3, kind: output, shape index: {0}]   ;;  %s1525_s4 = inlined_call_operand.vmem [shape: f32[1,8], index: 4, kind: output, shape index: {1}]   ;;  %s1526_s5 = inlined_call_operand.vmem [shape: f32[1,8], index: 5, kind: output, shape index: {2}]  }
   0x1 LB: > { %s975_s19 = sadd.s32 4294967295, %s1222_s18   ;;  %p979_p0 = scmp.ge.s32.totalorder %s1222_s18, 1  ;;  %s1222_s18 = sphi %s1264_s18, %s16_s18  }
   0x2   : > { %p184_p1 = scmp.lt.s32.totalorder %s1222_s18, 3 }
   0x4   : > { %p185_p2 = pnand %p979_p0, %p184_p1 }
   0x5   : > { %s980_s20 = sshll.u32 (!%p185_p2), %s975_s19, 3  ;;  %p220_p3 = scmp.lt.s32.totalorder (!%p185_p2), %s975_s19, 1 }
   0x6   : > { %188 = sbr.rel (%p185_p2) target bundleno = 583 (0x247), region = 32  ;;  %p214_p4 = scmp.lt.s32.totalorder (!%p185_p2), %s980_s20, 15 }
   0x7   : > { %p985_p5 = scmp.ne.s32.totalorder (!%p185_p2), %s975_s19, 0 }
   0xd   : > { %s221_s21 = scalar_select %p220_p3, %s975_s19, 1 }
   0xe   : > { %s1528_s20 = smov (!%p214_p4, %s980_s20), 15  ;;  %229 = sbr.rel (%p985_p5) target bundleno = 27 (0x1b), region = 36 }
   0xf   : > { %s1005_s22 = sshll.u32 %s221_s21, 6  ;;  %s1004_s23 = sshll.u32 %s1528_s20, 4  ;;  %vm230_vm0 = vcmask (!%p985_p5), 31744   ;;  %vm232_vm1 = vcmask (!%p985_p5), 25600   ;;  %vm252_vm2 = vcmask (!%p985_p5), 57344   ;;  %v1224_v0 = vmov (!%p985_p5), 0.0  }
  0x10   : > { %s1275_s26 = scalar_lea.vmem %s1524_s3, %s1005_s22  ;;  %s1280_s29 = scalar_lea.vmem %s1521_s0, %s1004_s23  ;;  %231 = vst.msk [vmem:[#allocation2] sm:$0xff] (!%p985_p5), %vm230_vm0, %v1224_v0  ;;  %234 = vst.msk [vmem:[#allocation2 + $0x10] sm:$0xff] (!%p985_p5), %vm230_vm0, %v1224_v0 }
  0x11   : > { %236 = vst.msk [vmem:[#allocation2 + $0x20] sm:$0xff] (!%p985_p5), %vm230_vm0, %v1224_v0  ;;  %238 = vst.msk [vmem:[#allocation2 + $0x30] sm:$0xff] (!%p985_p5), %vm230_vm0, %v1224_v0 }
  0x12   : > { %240 = vst.msk [vmem:[#allocation2 + $0x40] sm:$0xff] (!%p985_p5), %vm230_vm0, %v1224_v0  ;;  %242 = vst.msk [vmem:[#allocation2 + $0x50] sm:$0xff] (!%p985_p5), %vm230_vm0, %v1224_v0 }
  0x13   : > { %244 = vst.msk [vmem:[#allocation2 + $0x60] sm:$0xff] (!%p985_p5), %vm230_vm0, %v1224_v0  ;;  %246 = vst.msk [vmem:[#allocation2 + $0x70] sm:$0xff] (!%p985_p5), %vm230_vm0, %v1224_v0 }
  0x14   : > { %248 = vst.msk [vmem:[#allocation2 + $0x80] sm:$0xff] (!%p985_p5), %vm230_vm0, %v1224_v0  ;;  %250 = vst.msk [vmem:[#allocation2 + $0x90] sm:$0xff] (!%p985_p5), %vm230_vm0, %v1224_v0 }
  0x15   : > { %233 = vst.msk [vmem:[#allocation2 + $0x8] sm:$0x3] %vm232_vm1, %v1224_v0  ;;  %235 = vst.msk [vmem:[#allocation2 + $0x18] sm:$0x3] %vm232_vm1, %v1224_v0 }
  0x16   : > { %237 = vst.msk [vmem:[#allocation2 + $0x28] sm:$0x3] %vm232_vm1, %v1224_v0  ;;  %239 = vst.msk [vmem:[#allocation2 + $0x38] sm:$0x3] %vm232_vm1, %v1224_v0 }
  0x17   : > { %241 = vst.msk [vmem:[#allocation2 + $0x48] sm:$0x3] %vm232_vm1, %v1224_v0  ;;  %243 = vst.msk [vmem:[#allocation2 + $0x58] sm:$0x3] %vm232_vm1, %v1224_v0 }
  0x18   : > { %245 = vst.msk [vmem:[#allocation2 + $0x68] sm:$0x3] %vm232_vm1, %v1224_v0  ;;  %247 = vst.msk [vmem:[#allocation2 + $0x78] sm:$0x3] %vm232_vm1, %v1224_v0 }
  0x19   : > { %249 = vst.msk [vmem:[#allocation2 + $0x88] sm:$0x3] %vm232_vm1, %v1224_v0  ;;  %251 = vst.msk [vmem:[#allocation2 + $0x98] sm:$0x3] %vm232_vm1, %v1224_v0 }
  0x1a   : > { %253 = vst.msk [vmem:[%s1525_s4] sm:$0x1] %vm252_vm2, %v1224_v0  ;;  %254 = vst.msk [vmem:[%s1526_s5] sm:$0x1] %vm252_vm2, %v1224_v0 }
  0x1b PF: > { %v257_v1 = vld [vmem:[%s1280_s29 + $0x20] sm:$0xff]  ;;  %v988_v2 = vld [vmem:[%s1280_s29 + $0x28] sm:$0xff]  ;;  %v258_v6 = vld [vmem:[%s1280_s29 + $0x30] sm:$0xff]  ;;  %s1225_s9 = smov 124   ;;  %vm321_vm3 = vcmask 31744   ;;  %s1226_s10 = smov 4  }
  0x1c   : > { %v255_v3 = vld [vmem:[%s1280_s29] sm:$0xff]  ;;  %v274_v4 = vmax.f32 %v257_v1, %v988_v2  ;;  %v986_v5 = vld [vmem:[%s1280_s29 + $0x8] sm:$0xff]  ;;  %v989_v7 = vld [vmem:[%s1280_s29 + $0x38] sm:$0xff]  ;;  %s1227_s11 = smov 8   ;;  %s1228_s12 = smov 12   ;;  %vm774_vm4 = vcmask 1041408  }
  0x1d   : > { %v272_v8 = vmax.f32 %v255_v3, %v986_v5  ;;  %v256_v9 = vld [vmem:[%s1280_s29 + $0x10] sm:$0xff]  ;;  %v987_v10 = vld [vmem:[%s1280_s29 + $0x18] sm:$0xff]  ;;  %v275_v11 = vmax.f32 %v258_v6, %v989_v7  ;;  %v259_v15 = vld [vmem:[%s1280_s29 + $0x40] sm:$0xff]  ;;  %s1229_s15 = smov 16   ;;  %s1230_s19 = smov 20   ;;  %vm667_vm5 = vcmask 64512  }
  0x1e   : > { %292 = vrot.lane.b32.xlu1 %v274_v4, %s1225_s9  ;;  %v273_v12 = vmax.f32 %v256_v9, %v987_v10  ;;  %v260_v13 = vld [vmem:[%s1280_s29 + $0x50] sm:$0xff]  ;;  %v991_v14 = vld [vmem:[%s1280_s29 + $0x58] sm:$0xff]  ;;  %v990_v16 = vld [vmem:[%s1280_s29 + $0x48] sm:$0xff]  ;;  %s1231_s22 = smov 24   ;;  %s1232_s23 = smov 28   ;;  %vm676_vm6 = vcmask 97280  }
  0x1f   : > { %288 = vrot.lane.b32.xlu0 %v272_v8, %s1225_s9  ;;  %v277_v17 = vmax.f32 %v260_v13, %v991_v14  ;;  %v276_v18 = vmax.f32 %v259_v15, %v990_v16  ;;  %v262_v19 = vld [vmem:[%s1280_s29 + $0x70] sm:$0xff]  ;;  %v993_v20 = vld [vmem:[%s1280_s29 + $0x78] sm:$0xff]  ;;  %v261_v21 = vld [vmem:[%s1280_s29 + $0x60] sm:$0xff]  ;;  %s1233_s24 = smov 32   ;;  %vm685_vm7 = vcmask 130048   ;;  %vm694_vm8 = vcmask 162816  }
  0x20   : > { %v992_v22 = vld [vmem:[%s1280_s29 + $0x68] sm:$0xff]  ;;  %v279_v23 = vmax.f32 %v262_v19, %v993_v20  ;;  %v1213_v61 = vld [vmem:[%s1522_s1] sm:$0xff]   ;;  %v1215_v5 = vld [vmem:[%s1522_s1 + $0x10] ss:$0 sps:$4 sm:$0x33]   ;;  %vm703_vm9 = vcmask 195584  }
  0x21   : > { %v278_v24 = vmax.f32 %v261_v21, %v992_v22  ;;  %v338_v35 = vld [vmem:[#allocation2 + $0x1] sm:$0xff]  ;;  %1013 = vmatprep.subr.bf16.mxu0 %v1213_v61  ;;  %1027 = vmatprep.subr.bf16.mxu1 %v1213_v61  ;;  %v776_v6 = vsel %vm774_vm4, %v1215_v5, 0  ;;  %vm712_vm10 = vcmask 228352   ;;  %vm721_vm11 = vcmask 261120  }
  0x22   : > { %294 = vrot.lane.b32.xlu1 %v275_v11, %s1225_s9  ;;  %v346_v41 = vld [vmem:[#allocation2 + $0x2] sm:$0xff]  ;;  %1014 = vmatpush3.bf16.msra.mxu0 %v1213_v61  ;;  %vm761_vm12 = vcmask 293888   ;;  %vm866_vm13 = vcmask 57344  }
  0x23   : > { %290 = vrot.lane.b32.xlu0 %v273_v12, %s1225_s9  ;;  %1030 = vmatpush3.bf16.msra.mxu1 %v1213_v61  ;;  %v1214_v1 = vld [vmem:[%s1522_s1 + $0x8] sm:$0xff]  }
  0x24   : > { %1015 = vmatprep.subr.bf16.mxu0 %v1214_v1  ;;  %1028 = vmatprep.subr.bf16.mxu1 %v1214_v1 }
  0x26   : > { %298 = vrot.lane.b32.xlu1 %v277_v17, %s1225_s9  ;;  %1016 = vmatpush3.bf16.msra.mxu0 %v1214_v1 }
  0x27   : > { %296 = vrot.lane.b32.xlu0 %v276_v18, %s1225_s9  ;;  %1031 = vmatpush3.bf16.msra.mxu1 %v1214_v1 }
  0x28   : > { %1033 = vmatprep.subr.msk.bf16.mxu0 %vm774_vm4, %v1215_v5  ;;  %1034 = vmatprep.subr.msk.bf16.mxu1 %vm774_vm4, %v1215_v5 }
  0x2a   : > { %302 = vrot.lane.b32.xlu1 %v279_v23, %s1225_s9  ;;  %1018 = vmatpush3.bf16.msra.mxu0 %v776_v6 }
  0x2b   : > { %300 = vrot.lane.b32.xlu0 %v278_v24, %s1225_s9  ;;  %1032 = vmatpush3.bf16.msra.mxu1 %v776_v6 }
  0x90   : > { %v293_v25 = vpop.permute.xlu1 %292 }
  0x91   : > { %v314_v26 = vmax.f32 %v274_v4, %v293_v25  ;;  %v289_v27 = vpop.permute.xlu0 %288 }
  0x92   : > { %v312_v28 = vmax.f32 %v272_v8, %v289_v27 }
  0x93   : > { %324 = vst.msk [vmem:[#allocation2 + $0x31] sm:$0xff] %vm321_vm3, %v314_v26 }
  0x94   : > { %322 = vst.msk [vmem:[#allocation2 + $0x11] sm:$0xff] %vm321_vm3, %v312_v28  ;;  %v295_v29 = vpop.permute.xlu1 %294 }
  0x95   : > { %v315_v30 = vmax.f32 %v275_v11, %v295_v29  ;;  %v291_v31 = vpop.permute.xlu0 %290 }
  0x96   : > { %v313_v32 = vmax.f32 %v273_v12, %v291_v31 }
  0x97   : > { %325 = vst.msk [vmem:[#allocation2 + $0x41] sm:$0xff] %vm321_vm3, %v315_v30  ;;  %v386_v30 = vld [vmem:[#allocation2 + $0x90] sm:$0xff] }
  0x98   : > { %323 = vst.msk [vmem:[#allocation2 + $0x21] sm:$0xff] %vm321_vm3, %v313_v32  ;;  %v299_v33 = vpop.permute.xlu1 %298  ;;  %v394_v32 = vld [vmem:[#allocation2 + $0x91] sm:$0xff] }
  0x99   : > { %v297_v34 = vpop.permute.xlu0 %296  ;;  %v317_v36 = vmax.f32 %v277_v17, %v299_v33 }
  0x9a   : > { %v316_v37 = vmax.f32 %v276_v18, %v297_v34  ;;  %v341_v43 = vld [vmem:[#allocation2 + $0x31] sm:$0xff] }
  0x9b   : > { %v339_v38 = vld [vmem:[#allocation2 + $0x11] sm:$0xff]  ;;  %327 = vst.msk [vmem:[#allocation2 + $0x61] sm:$0xff] %vm321_vm3, %v317_v36 }
  0x9c   : > { %326 = vst.msk [vmem:[#allocation2 + $0x51] sm:$0xff] %vm321_vm3, %v316_v37  ;;  %v1053_v39 = vpack.i.bf16 %v339_v38, %v338_v35  ;;  %v303_v40 = vpop.permute.xlu1 %302  ;;  %v347_v42 = vld [vmem:[#allocation2 + $0x12] sm:$0xff] }
  0x9d   : > { %v319_v44 = vmax.f32 %v279_v23, %v303_v40  ;;  %v301_v45 = vpop.permute.xlu0 %300  ;;  %v1063_v48 = vpack.i.bf16 %v347_v42, %v346_v41  ;;  %v349_v52 = vld [vmem:[#allocation2 + $0x32] sm:$0xff] }
  0x9e   : > { %1054 = vrot.lane.b32.xlu0 %v1053_v39, %s1226_s10  ;;  %v318_v46 = vmax.f32 %v278_v24, %v301_v45  ;;  %v1329_v53 = vld [vmem:[#allocation2 + $0x10] sm:$0xff]  ;;  %v1335_v57 = vld [vmem:[#allocation2 + $0x40] sm:$0xff] }
  0x9f   : > { %v340_v47 = vld [vmem:[#allocation2 + $0x21] sm:$0xff]  ;;  %329 = vst.msk [vmem:[#allocation2 + $0x81] sm:$0xff] %vm321_vm3, %v319_v44  ;;  %v1333_v56 = vld [vmem:[#allocation2 + $0x30] sm:$0xff] }
  0xa0   : > { %v1058_v49 = vpack.i.bf16 %v341_v43, %v340_v47  ;;  %328 = vst.msk [vmem:[#allocation2 + $0x71] sm:$0xff] %vm321_vm3, %v318_v46  ;;  %v1325_v50 = vld [vmem:[#allocation2 + $0x20] sm:$0xff]  ;;  %v1083_v58 = vpack.i.bf16 %v340_v47, %v339_v38  ;;  %v1078_v59 = vpack.i.bf16 %v1335_v57, %v1333_v56  ;;  %v402_v34 = vld [vmem:[#allocation2 + $0x92] sm:$0xff] }
  0xa1   : > { %v348_v51 = vld [vmem:[#allocation2 + $0x22] sm:$0xff]  ;;  %v1073_v54 = vpack.i.bf16 %v1325_v50, %v1329_v53  ;;  %v1103_v2 = vpack.i.bf16 %v1333_v56, %v1325_v50 }
  0xa2   : > { %1064 = vrot.lane.b32.xlu0 %v1063_v48, %s1227_s11  ;;  %1059 = vrot.lane.b32.xlu1 %v1058_v49, %s1226_s10  ;;  %v1068_v55 = vpack.i.bf16 %v349_v52, %v348_v51  ;;  %v365_v60 = vld [vmem:[#allocation2 + $0x41] sm:$0xff]  ;;  %v1093_v62 = vpack.i.bf16 %v348_v51, %v347_v42 }
  0xa3   : > { %v1088_v63 = vpack.i.bf16 %v365_v60, %v341_v43  ;;  %v373_v0 = vld [vmem:[#allocation2 + $0x42] sm:$0xff]  ;;  %v1353_v4 = vld [vmem:[#allocation2 + $0x50] sm:$0xff] }
  0xa4   : > { %v1098_v3 = vpack.i.bf16 %v373_v0, %v349_v52  ;;  %v1108_v7 = vpack.i.bf16 %v1353_v4, %v1335_v57  ;;  %v390_v8 = vld [vmem:[#allocation2 + $0x51] sm:$0xff]  ;;  %v344_v13 = vld [vmem:[#allocation2 + $0x61] sm:$0xff] }
  0xa5   : > { %v1118_v9 = vpack.i.bf16 %v390_v8, %v365_v60  ;;  %v398_v10 = vld [vmem:[#allocation2 + $0x52] sm:$0xff]  ;;  %v1368_v15 = vld [vmem:[#allocation2 + $0x60] sm:$0xff]  ;;  %v1163_v22 = vpack.i.bf16 %v344_v13, %v390_v8 }
  0xa6   : > { %1074 = vrot.lane.b32.xlu0 %v1073_v54, %s1228_s12  ;;  %1069 = vrot.lane.b32.xlu1 %v1068_v55, %s1227_s11  ;;  %v1133_v12 = vpack.i.bf16 %v398_v10, %v373_v0  ;;  %v352_v17 = vld [vmem:[#allocation2 + $0x62] sm:$0xff]  ;;  %v1153_v18 = vpack.i.bf16 %v1368_v15, %v1353_v4 }
  0xa7   : > { %v345_v11 = vld [vmem:[#allocation2 + $0x71] sm:$0xff]  ;;  %v361_v21 = vld [vmem:[#allocation2 + $0x80] sm:$0xff]  ;;  %v1173_v25 = vpack.i.bf16 %v352_v17, %v398_v10 }
  0xa8   : > { %v1138_v14 = vpack.i.bf16 %v345_v11, %v344_v13  ;;  %v353_v16 = vld [vmem:[#allocation2 + $0x72] sm:$0xff]  ;;  %v369_v24 = vld [vmem:[#allocation2 + $0x81] sm:$0xff]  ;;  %v1188_v31 = vpack.i.bf16 %v386_v30, %v361_v21 }
  0xa9   : > { %v1148_v19 = vpack.i.bf16 %v353_v16, %v352_v17  ;;  %v1374_v20 = vld [vmem:[#allocation2 + $0x70] sm:$0xff]  ;;  %v1168_v26 = vpack.i.bf16 %v369_v24, %v345_v11  ;;  %v377_v27 = vld [vmem:[#allocation2 + $0x82] sm:$0xff]  ;;  %v1198_v33 = vpack.i.bf16 %v394_v32, %v369_v24 }
  0xaa   : > { %1084 = vrot.lane.b32.xlu0 %v1083_v58, %s1229_s15  ;;  %1079 = vrot.lane.b32.xlu1 %v1078_v59, %s1228_s12  ;;  %v1158_v23 = vpack.i.bf16 %v361_v21, %v1374_v20  ;;  %v1183_v28 = vpack.i.bf16 %v1374_v20, %v1368_v15  ;;  %v1178_v29 = vpack.i.bf16 %v377_v27, %v353_v16  ;;  %v330_v47 = vld [vmem:[#allocation2] sm:$0xff] }
  0xab   : > { %v1208_v35 = vpack.i.bf16 %v402_v34, %v377_v27 }
  0xae   : > { %1094 = vrot.lane.b32.xlu0 %v1093_v62, %s1230_s19  ;;  %1089 = vrot.lane.b32.xlu1 %v1088_v63, %s1229_s15 }
  0xb2   : > { %1104 = vrot.lane.b32.xlu0 %v1103_v2, %s1231_s22  ;;  %1099 = vrot.lane.b32.xlu1 %v1098_v3, %s1230_s19 }
  0xb6   : > { %1114 = vrot.lane.b32.xlu0 %v1058_v49, %s1232_s23  ;;  %1109 = vrot.lane.b32.xlu1 %v1108_v7, %s1231_s22 }
  0xba   : > { %1124 = vrot.lane.b32.xlu0 %v1068_v55, %s1233_s24  ;;  %1119 = vrot.lane.b32.xlu1 %v1118_v9, %s1232_s23 }
  0xbe   : > { %1134 = vrot.lane.b32.xlu0 %v1133_v12, %s1233_s24  ;;  %1129 = vrot.lane.b32.xlu1 %v1118_v9, %s1226_s10 }
  0xc2   : > { %1144 = vrot.lane.b32.xlu0 %v1133_v12, %s1227_s11  ;;  %1139 = vrot.lane.b32.xlu1 %v1138_v14, %s1226_s10 }
  0xc6   : > { %1154 = vrot.lane.b32.xlu0 %v1153_v18, %s1228_s12  ;;  %1149 = vrot.lane.b32.xlu1 %v1148_v19, %s1227_s11 }
  0xca   : > { %1164 = vrot.lane.b32.xlu0 %v1163_v22, %s1229_s15  ;;  %1159 = vrot.lane.b32.xlu1 %v1158_v23, %s1228_s12 }
  0xce   : > { %1174 = vrot.lane.b32.xlu0 %v1173_v25, %s1230_s19  ;;  %1169 = vrot.lane.b32.xlu1 %v1168_v26, %s1229_s15 }
  0xd2   : > { %1184 = vrot.lane.b32.xlu0 %v1183_v28, %s1231_s22  ;;  %1179 = vrot.lane.b32.xlu1 %v1178_v29, %s1230_s19 }
  0xd6   : > { %1194 = vrot.lane.b32.xlu0 %v1138_v14, %s1232_s23  ;;  %1189 = vrot.lane.b32.xlu1 %v1188_v31, %s1231_s22 }
  0xda   : > { %1204 = vrot.lane.b32.xlu0 %v1148_v19, %s1233_s24  ;;  %1199 = vrot.lane.b32.xlu1 %v1198_v33, %s1232_s23 }
  0xde   : > { %1209 = vrot.lane.b32.xlu1 %v1208_v35, %s1233_s24 }
 0x110   : > { %v1055_v36 = vpop.permute.xlu0 %1054 }
 0x111   : > { %v1057_v43 = vunpack.i.h.bf16 %v1055_v36  ;;  %v1056_v44 = vunpack.i.l.bf16 %v1055_v36 }
 0x113   : > { %v660_v54 = vsel %vm321_vm3, %v1329_v53, %v1057_v43  ;;  %v659_v55 = vsel %vm321_vm3, %v330_v47, %v1056_v44 }
 0x114   : > { %v1060_v37 = vpop.permute.xlu1 %1059  ;;  %v1065_v38 = vpop.permute.xlu0 %1064 }
 0x115   : > { %v1062_v48 = vunpack.i.h.bf16 %v1060_v37  ;;  %v1061_v49 = vunpack.i.l.bf16 %v1060_v37  ;;  %v1067_v51 = vunpack.i.h.bf16 %v1065_v38  ;;  %v1066_v52 = vunpack.i.l.bf16 %v1065_v38 }
 0x117   : > { %v662_v2 = vsel %vm321_vm3, %v1333_v56, %v1062_v48  ;;  %v661_v3 = vsel %vm321_vm3, %v1325_v50, %v1061_v49  ;;  %v668_v53 = vsel %vm667_vm5, %v659_v55, %v1066_v52  ;;  %v669_v7 = vsel %vm667_vm5, %v660_v54, %v1067_v51 }
 0x118   : > { %v1070_v39 = vpop.permute.xlu1 %1069  ;;  %v1075_v40 = vpop.permute.xlu0 %1074 }
 0x119   : > { %v1072_v58 = vunpack.i.h.bf16 %v1070_v39  ;;  %v1071_v59 = vunpack.i.l.bf16 %v1070_v39  ;;  %v1077_v62 = vunpack.i.h.bf16 %v1075_v40  ;;  %v1076_v63 = vunpack.i.l.bf16 %v1075_v40 }
 0x11b   : > { %v670_v10 = vsel %vm667_vm5, %v661_v3, %v1071_v59  ;;  %v671_v11 = vsel %vm667_vm5, %v662_v2, %v1072_v58  ;;  %v677_v16 = vsel %vm676_vm6, %v668_v53, %v1076_v63  ;;  %v678_v50 = vsel %vm676_vm6, %v669_v7, %v1077_v62 }
 0x11c   : > { %v1080_v41 = vpop.permute.xlu1 %1079  ;;  %v1085_v42 = vpop.permute.xlu0 %1084 }
 0x11d   : > { %v1082_v0 = vunpack.i.h.bf16 %v1080_v41  ;;  %v1081_v1 = vunpack.i.l.bf16 %v1080_v41  ;;  %v1087_v5 = vunpack.i.h.bf16 %v1085_v42  ;;  %v1086_v6 = vunpack.i.l.bf16 %v1085_v42 }
 0x11f   : > { %v679_v17 = vsel %vm676_vm6, %v670_v10, %v1081_v1  ;;  %v680_v18 = vsel %vm676_vm6, %v671_v11, %v1082_v0  ;;  %v686_v19 = vsel %vm685_vm7, %v677_v16, %v1086_v6  ;;  %v687_v21 = vsel %vm685_vm7, %v678_v50, %v1087_v5 }
 0x120   : > { %v1392_v45 = vpop.permute.xlu1 %1089  ;;  %v1095_v46 = vpop.permute.xlu0 %1094 }
 0x121   : > { %v1097_v8 = vunpack.i.h.bf16 %v1095_v46  ;;  %v1096_v9 = vunpack.i.l.bf16 %v1095_v46  ;;  %v1092_v24 = vunpack.i.h.bf16 %v1392_v45  ;;  %v1091_v25 = vunpack.i.l.bf16 %v1392_v45 }
 0x123   : > { %v695_v26 = vsel %vm694_vm8, %v686_v19, %v1096_v9  ;;  %v696_v27 = vsel %vm694_vm8, %v687_v21, %v1097_v8  ;;  %v688_v42 = vsel %vm685_vm7, %v679_v17, %v1091_v25  ;;  %v689_v43 = vsel %vm685_vm7, %v680_v18, %v1092_v24 }
 0x124   : > { %v1100_v60 = vpop.permute.xlu1 %1099  ;;  %v1105_v61 = vpop.permute.xlu0 %1104 }
 0x125   : > { %v1107_v12 = vunpack.i.h.bf16 %v1105_v61  ;;  %v1106_v13 = vunpack.i.l.bf16 %v1105_v61  ;;  %v1102_v28 = vunpack.i.h.bf16 %v1100_v60  ;;  %v1101_v29 = vunpack.i.l.bf16 %v1100_v60 }
 0x127   : > { %v704_v30 = vsel %vm703_vm9, %v695_v26, %v1106_v13  ;;  %v705_v31 = vsel %vm703_vm9, %v696_v27, %v1107_v12  ;;  %v697_v46 = vsel %vm694_vm8, %v688_v42, %v1101_v29  ;;  %v698_v47 = vsel %vm694_vm8, %v689_v43, %v1102_v28 }
 0x128   : > { %v1110_v14 = vpop.permute.xlu1 %1109  ;;  %v1115_v56 = vpop.permute.xlu0 %1114 }
 0x129   : > { %v1117_v22 = vunpack.i.h.bf16 %v1115_v56  ;;  %v1116_v23 = vunpack.i.l.bf16 %v1115_v56  ;;  %v1112_v34 = vunpack.i.h.bf16 %v1110_v14  ;;  %v1111_v35 = vunpack.i.l.bf16 %v1110_v14 }
 0x12b   : > { %v713_v40 = vsel %vm712_vm10, %v704_v30, %v1116_v23  ;;  %v714_v41 = vsel %vm712_vm10, %v705_v31, %v1117_v22  ;;  %v707_v52 = vsel %vm703_vm9, %v698_v47, %v1112_v34  ;;  %v706_v54 = vsel %vm703_vm9, %v697_v46, %v1111_v35 }
 0x12c   : > { %v1120_v32 = vpop.permute.xlu1 %1119  ;;  %v1125_v33 = vpop.permute.xlu0 %1124 }
 0x12d   : > { %v1127_v36 = vunpack.i.h.bf16 %v1125_v33  ;;  %v1126_v37 = vunpack.i.l.bf16 %v1125_v33  ;;  %v1122_v38 = vunpack.i.h.bf16 %v1120_v32  ;;  %v1121_v39 = vunpack.i.l.bf16 %v1120_v32 }
 0x12f   : > { %v722_v44 = vsel %vm721_vm11, %v713_v40, %v1126_v37  ;;  %v723_v45 = vsel %vm721_vm11, %v714_v41, %v1127_v36  ;;  %v715_v59 = vsel %vm712_vm10, %v706_v54, %v1121_v39  ;;  %v716_v60 = vsel %vm712_vm10, %v707_v52, %v1122_v38 }
 0x130   : > { %v1130_v48 = vpop.permute.xlu1 %1129  ;;  %v1135_v49 = vpop.permute.xlu0 %1134  ;;  %v730_v51 = vpack.c.bf16 %v723_v45, %v722_v44 }
 0x131   : > { %v1137_v55 = vunpack.i.h.bf16 %v1135_v49  ;;  %v1136_v58 = vunpack.i.l.bf16 %v1135_v49  ;;  %v1132_v53 = vunpack.i.h.bf16 %v1130_v48  ;;  %v1131_v7 = vunpack.i.l.bf16 %v1130_v48 }
 0x132   : > { %1019 = vmatprep.mubr.msk.bf16.mxu0 %vm761_vm12, %v730_v51 }
 0x133   : > { %v725_v61 = vsel %vm721_vm11, %v716_v60, %v1137_v55  ;;  %v724_v62 = vsel %vm721_vm11, %v715_v59, %v1136_v58  ;;  %v663_v14 = vsel %vm321_vm3, %v1335_v57, %v1131_v7  ;;  %v664_v56 = vsel %vm321_vm3, %v1353_v4, %v1132_v53 }
 0x134   : > { %v731_v63 = vpack.c.bf16 %v725_v61, %v724_v62  ;;  %v1140_v0 = vpop.permute.xlu1 %1139  ;;  %v1145_v1 = vpop.permute.xlu0 %1144 }
 0x135   : > { %v1142_v10 = vunpack.i.h.bf16 %v1140_v0  ;;  %v1141_v11 = vunpack.i.l.bf16 %v1140_v0  ;;  %v1147_v12 = vunpack.i.h.bf16 %v1145_v1  ;;  %v1146_v13 = vunpack.i.l.bf16 %v1145_v1 }
 0x136   : > { %1020 = vmatmul.mubr.msk.bf16.vlgmr.msra.gmra.mrb[0].mxu0 %vm761_vm12, %v731_v63 }
 0x137   : > { %v665_v24 = vsel %vm321_vm3, %v1368_v15, %v1141_v11  ;;  %v666_v25 = vsel %vm321_vm3, %v1374_v20, %v1142_v10  ;;  %v673_v57 = vsel %vm667_vm5, %v664_v56, %v1147_v12  ;;  %v672_v4 = vsel %vm667_vm5, %v663_v14, %v1146_v13 }
 0x138   : > { %v1150_v2 = vpop.permute.xlu1 %1149  ;;  %v1155_v3 = vpop.permute.xlu0 %1154 }
 0x139   : > { %v1152_v16 = vunpack.i.h.bf16 %v1150_v2  ;;  %v1151_v50 = vunpack.i.l.bf16 %v1150_v2  ;;  %v1157_v19 = vunpack.i.h.bf16 %v1155_v3  ;;  %v1156_v21 = vunpack.i.l.bf16 %v1155_v3 }
 0x13b   : > { %v674_v30 = vsel %vm667_vm5, %v665_v24, %v1151_v50  ;;  %v675_v31 = vsel %vm667_vm5, %v666_v25, %v1152_v16  ;;  %v681_v15 = vsel %vm676_vm6, %v672_v4, %v1156_v21  ;;  %v682_v20 = vsel %vm676_vm6, %v673_v57, %v1157_v19  ;;  %v994_v50 = vld [vmem:[%s1523_s2] ss:$0 sm:$0xff] }
 0x13c   : > { %v1160_v5 = vpop.permute.xlu1 %1159  ;;  %v1165_v6 = vpop.permute.xlu0 %1164 }
 0x13d   : > { %v1162_v22 = vunpack.i.h.bf16 %v1160_v5  ;;  %v1161_v23 = vunpack.i.l.bf16 %v1160_v5  ;;  %v1167_v26 = vunpack.i.h.bf16 %v1165_v6  ;;  %v1166_v27 = vunpack.i.l.bf16 %v1165_v6 }
 0x13f   : > { %v683_v36 = vsel %vm676_vm6, %v674_v30, %v1161_v23  ;;  %v684_v37 = vsel %vm676_vm6, %v675_v31, %v1162_v22  ;;  %v690_v38 = vsel %vm685_vm7, %v681_v15, %v1166_v27  ;;  %v691_v39 = vsel %vm685_vm7, %v682_v20, %v1167_v26 }
 0x140   : > { %v1170_v8 = vpop.permute.xlu1 %1169  ;;  %v1175_v9 = vpop.permute.xlu0 %1174 }
 0x141   : > { %v1177_v28 = vunpack.i.h.bf16 %v1175_v9  ;;  %v1176_v29 = vunpack.i.l.bf16 %v1175_v9  ;;  %v1172_v42 = vunpack.i.h.bf16 %v1170_v8  ;;  %v1171_v43 = vunpack.i.l.bf16 %v1170_v8 }
 0x143   : > { %v699_v44 = vsel %vm694_vm8, %v690_v38, %v1176_v29  ;;  %v700_v45 = vsel %vm694_vm8, %v691_v39, %v1177_v28  ;;  %v692_v0 = vsel %vm685_vm7, %v683_v36, %v1171_v43  ;;  %v693_v1 = vsel %vm685_vm7, %v684_v37, %v1172_v42 }
 0x144   : > { %v1180_v17 = vpop.permute.xlu1 %1179  ;;  %v1185_v18 = vpop.permute.xlu0 %1184 }
 0x145   : > { %v1187_v32 = vunpack.i.h.bf16 %v1185_v18  ;;  %v1186_v33 = vunpack.i.l.bf16 %v1185_v18  ;;  %v1182_v46 = vunpack.i.h.bf16 %v1180_v17  ;;  %v1181_v47 = vunpack.i.l.bf16 %v1180_v17 }
 0x147   : > { %v708_v48 = vsel %vm703_vm9, %v699_v44, %v1186_v33  ;;  %v709_v49 = vsel %vm703_vm9, %v700_v45, %v1187_v32  ;;  %v701_v5 = vsel %vm694_vm8, %v692_v0, %v1181_v47  ;;  %v702_v6 = vsel %vm694_vm8, %v693_v1, %v1182_v46 }
 0x148   : > { %v1190_v34 = vpop.permute.xlu1 %1189  ;;  %v1195_v35 = vpop.permute.xlu0 %1194 }
 0x149   : > { %v1197_v40 = vunpack.i.h.bf16 %v1195_v35  ;;  %v1196_v41 = vunpack.i.l.bf16 %v1195_v35  ;;  %v1192_v54 = vunpack.i.h.bf16 %v1190_v34  ;;  %v1191_v55 = vunpack.i.l.bf16 %v1190_v34 }
 0x14b   : > { %v717_v62 = vsel %vm712_vm10, %v708_v48, %v1196_v41  ;;  %v718_v63 = vsel %vm712_vm10, %v709_v49, %v1197_v40  ;;  %v710_v8 = vsel %vm703_vm9, %v701_v5, %v1191_v55  ;;  %v711_v9 = vsel %vm703_vm9, %v702_v6, %v1192_v54 }
 0x14c   : > { %v1200_v51 = vpop.permute.xlu1 %1199  ;;  %v1205_v52 = vpop.permute.xlu0 %1204 }
 0x14d   : > { %v1207_v58 = vunpack.i.h.bf16 %v1205_v52  ;;  %v1206_v59 = vunpack.i.l.bf16 %v1205_v52  ;;  %v1202_v60 = vunpack.i.h.bf16 %v1200_v51  ;;  %v1201_v61 = vunpack.i.l.bf16 %v1200_v51 }
 0x14f   : > { %v726_v2 = vsel %vm721_vm11, %v717_v62, %v1206_v59  ;;  %v727_v3 = vsel %vm721_vm11, %v718_v63, %v1207_v58  ;;  %v719_v12 = vsel %vm712_vm10, %v710_v8, %v1201_v61  ;;  %v720_v13 = vsel %vm712_vm10, %v711_v9, %v1202_v60 }
 0x150   : > { %v1210_v53 = vpop.permute.xlu1 %1209  ;;  %v732_v7 = vpack.c.bf16 %v727_v3, %v726_v2 }
 0x151   : > { %v1212_v10 = vunpack.i.h.bf16 %v1210_v53  ;;  %v1211_v11 = vunpack.i.l.bf16 %v1210_v53 }
 0x152   : > { %1023 = vmatprep.mubr.msk.bf16.mxu1 %vm761_vm12, %v732_v7 }
 0x153   : > { %v728_v14 = vsel %vm721_vm11, %v719_v12, %v1211_v11  ;;  %v729_v56 = vsel %vm721_vm11, %v720_v13, %v1212_v10 }
 0x154   : > { %v733_v16 = vpack.c.bf16 %v729_v56, %v728_v14 }
 0x156   : > { %1024 = vmatmul.mubr.msk.bf16.vlgmr.msra.gmra.mrb[0].mxu1 %vm761_vm12, %v733_v16 }
 0x209   : > { %v1021_v17 = vpop.f32.mrb[0].mxu0 }
 0x20a   : > { %v821_v18 = vadd.f32 %v1021_v17, %v994_v50  ;;  %v812_v19 = vpop.f32.mrb[1].mxu0 }
 0x20b   : > { %v813_v21 = vadd.f32 %v994_v50, %v812_v19  ;;  %v1022_v22 = vpop.f32.mrb[2].mxu0  ;;  %v868_v19 = vld [vmem:[%s1526_s5] sm:$0x1] }
 0x20c   : > { %902 = vst.msk [vmem:[%s1275_s26 + $0x10] sm:$0xff] %vm667_vm5, %v821_v18  ;;  %v824_v23 = vadd.f32 %v1022_v22, %v994_v50  ;;  %v815_v24 = vpop.f32.mrb[3].mxu0  ;;  %v871_v27 = vmul.f32 %v821_v18, %v821_v18  ;;  %v847_v30 = vsel %vm667_vm5, %v821_v18, 0.0 }
 0x20d   : > { %v869_v25 = vmul.f32 %v813_v21, %v813_v21  ;;  %900 = vst.msk [vmem:[%s1275_s26] sm:$0xff] %vm667_vm5, %v813_v21  ;;  %v816_v26 = vadd.f32 %v994_v50, %v815_v24  ;;  %v844_v57 = vsel %vm667_vm5, %v813_v21, 0.0 }
 0x20e   : > { %903 = vst.msk [vmem:[%s1275_s26 + $0x18] sm:$0xff] %vm667_vm5, %v824_v23  ;;  %v872_v32 = vmul.f32 %v824_v23, %v824_v23  ;;  %v880_v15 = vsel %vm667_vm5, %v871_v27, 0.0  ;;  %v849_v20 = vsel %vm667_vm5, %v824_v23, 0.0 }
 0x20f   : > { %v845_v4 = vsel %vm667_vm5, %v816_v26, 0.0  ;;  %v870_v28 = vmul.f32 %v816_v26, %v816_v26  ;;  %901 = vst.msk [vmem:[%s1275_s26 + $0x8] sm:$0xff] %vm667_vm5, %v816_v26  ;;  %v877_v31 = vsel %vm667_vm5, %v869_v25, 0.0 }
 0x210   : > { %v846_v29 = vadd.f32 %v845_v4, %v844_v57  ;;  %v882_v38 = vsel %vm667_vm5, %v872_v32, 0.0 }
 0x211   : > { %v878_v33 = vsel %vm667_vm5, %v870_v28, 0.0 }
 0x212   : > { %v848_v34 = vadd.f32 %v847_v30, %v846_v29  ;;  %v879_v35 = vadd.f32 %v878_v33, %v877_v31 }
 0x214   : > { %v881_v36 = vadd.f32 %v880_v15, %v879_v35  ;;  %v850_v37 = vadd.f32 %v849_v20, %v848_v34 }
 0x216   : > { %v883_v39 = vadd.f32 %v882_v38, %v881_v36 }
 0x229   : > { %v1025_v40 = vpop.f32.mrb[0].mxu1 }
 0x22a   : > { %v837_v41 = vadd.f32 %v1025_v40, %v994_v50  ;;  %v828_v42 = vpop.f32.mrb[1].mxu1 }
 0x22b   : > { %v829_v43 = vadd.f32 %v994_v50, %v828_v42  ;;  %v1026_v44 = vpop.f32.mrb[2].mxu1 }
 0x22c   : > { %906 = vst.msk [vmem:[%s1275_s26 + $0x30] sm:$0xff] %vm667_vm5, %v837_v41  ;;  %v840_v45 = vadd.f32 %v1026_v44, %v994_v50  ;;  %v831_v46 = vpop.f32.mrb[3].mxu1  ;;  %v875_v52 = vmul.f32 %v837_v41, %v837_v41  ;;  %v855_v61 = vsel %vm667_vm5, %v837_v41, 0.0 }
 0x22d   : > { %v851_v47 = vsel %vm667_vm5, %v829_v43, 0.0  ;;  %v873_v48 = vmul.f32 %v829_v43, %v829_v43  ;;  %904 = vst.msk [vmem:[%s1275_s26 + $0x20] sm:$0xff] %vm667_vm5, %v829_v43  ;;  %v832_v49 = vadd.f32 %v994_v50, %v831_v46  ;;  %v843_v50 = vld [vmem:[%s1525_s4] sm:$0x1] }
 0x22e   : > { %v852_v51 = vadd.f32 %v851_v47, %v850_v37  ;;  %907 = vst.msk [vmem:[%s1275_s26 + $0x38] sm:$0xff] %vm667_vm5, %v840_v45  ;;  %v876_v62 = vmul.f32 %v840_v45, %v840_v45  ;;  %v888_v2 = vsel %vm667_vm5, %v875_v52, 0.0  ;;  %v857_v3 = vsel %vm667_vm5, %v840_v45, 0.0 }
 0x22f   : > { %v884_v54 = vsel %vm667_vm5, %v873_v48, 0.0  ;;  %v853_v55 = vsel %vm667_vm5, %v832_v49, 0.0  ;;  %v874_v58 = vmul.f32 %v832_v49, %v832_v49  ;;  %905 = vst.msk [vmem:[%s1275_s26 + $0x28] sm:$0xff] %vm667_vm5, %v832_v49 }
 0x230   : > { %v885_v59 = vadd.f32 %v884_v54, %v883_v39  ;;  %v854_v60 = vadd.f32 %v853_v55, %v852_v51  ;;  %v890_v53 = vsel %vm667_vm5, %v876_v62, 0.0 }
 0x231   : > { %v886_v63 = vsel %vm667_vm5, %v874_v58, 0.0 }
 0x232   : > { %v856_v0 = vadd.f32 %v855_v61, %v854_v60  ;;  %v887_v1 = vadd.f32 %v886_v63, %v885_v59 }
 0x234   : > { %v858_v5 = vadd.f32 %v857_v3, %v856_v0  ;;  %v889_v6 = vadd.f32 %v888_v2, %v887_v1 }
 0x236   : > { %v859_v7 = vrot.slane %v858_v5, 4  ;;  %v891_v8 = vadd.f32 %v890_v53, %v889_v6 }
 0x238   : > { %v860_v9 = vadd.f32 %v859_v7, %v858_v5  ;;  %v892_v10 = vrot.slane %v891_v8, 4 }
 0x23a   : > { %v861_v11 = vrot.slane %v860_v9, 2  ;;  %v893_v12 = vadd.f32 %v892_v10, %v891_v8 }
 0x23c   : > { %v862_v13 = vadd.f32 %v861_v11, %v860_v9  ;;  %v894_v14 = vrot.slane %v893_v12, 2 }
 0x23e   : > { %v863_v56 = vrot.slane %v862_v13, 1  ;;  %v895_v16 = vadd.f32 %v894_v14, %v893_v12 }
 0x240   : > { %v864_v17 = vadd.f32 %v863_v56, %v862_v13  ;;  %v896_v18 = vrot.slane %v895_v16, 1 }
 0x242   : > { %v865_v21 = vadd.f32 %v864_v17, %v843_v50  ;;  %v897_v22 = vadd.f32 %v896_v18, %v895_v16 }
 0x244   : > { %867 = vst.msk [vmem:[%s1525_s4] sm:$0x1] %vm866_vm13, %v865_v21  ;;  %v898_v23 = vadd.f32 %v897_v22, %v868_v19 }
 0x246   : > { %899 = vst.msk [vmem:[%s1526_s5] sm:$0x1] %vm866_vm13, %v898_v23 }
 0x247 PF: > { %s16_s18 = sadd.s32 1, %s1222_s18  }
 0x248   : > { %p13_p6 = scmp.ge.s32.totalorder %s16_s18, 4  }
 0x24a   :  { %15 = sbr.rel (!%p13_p6) target bundleno = 1 (0x1), region = 85 }

// kernel: down_forward.4
= control target key start
LH: loop header
LB: loop body
LE: loop exit
PB: predicated region body
PF: predicated region fallthrough
CT: control target
= control target key end

     0   :  { %s1325_s24 = smov 0   ;;  %s1594_s0 = inlined_call_operand.vmem [shape: f32[2,8,8,8], index: 0, kind: input, shape index: {}]   ;;  %s1595_s1 = inlined_call_operand.vmem [shape: f32[1,8], index: 1, kind: input, shape index: {}]   ;;  %s1596_s2 = inlined_call_operand.vmem [shape: f32[1,8], index: 2, kind: input, shape index: {}]   ;;  %s1597_s3 = inlined_call_operand.vmem [shape: bf16[72,8], index: 3, kind: input, shape index: {}]   ;;  %s1598_s4 = inlined_call_operand.vmem [shape: f32[1,8], index: 4, kind: input, shape index: {}]   ;;  %s1599_s5 = inlined_call_operand.vmem [shape: f32[2,8,8,8], index: 5, kind: output, shape index: {0}]   ;;  %s1600_s6 = inlined_call_operand.vmem [shape: f32[1,8], index: 6, kind: output, shape index: {1}]   ;;  %s1601_s7 = inlined_call_operand.vmem [shape: f32[1,8], index: 7, kind: output, shape index: {2}]  }
   0x1 LB: > { %s1021_s25 = sadd.s32 4294967295, %s1274_s24   ;;  %p1025_p0 = scmp.ge.s32.totalorder %s1274_s24, 1  ;;  %s1274_s24 = sphi %s1325_s24, %s18_s24  }
   0x2   : > { %p232_p1 = scmp.lt.s32.totalorder %s1274_s24, 3 }
   0x4   : > { %p233_p2 = pnand %p1025_p0, %p232_p1 }
   0x5   : > { %p264_p3 = scmp.lt.s32.totalorder (!%p233_p2), %s1021_s25, 1  ;;  %p1030_p4 = scmp.ne.s32.totalorder (!%p233_p2), %s1021_s25, 0 }
   0x6   : > { %236 = sbr.rel (%p233_p2) target bundleno = 467 (0x1d3), region = 40 }
   0xd   : > { %s265_s26 = scalar_select %p264_p3, %s1021_s25, 1 }
   0xe   : > { %278 = sbr.rel (%p1030_p4) target bundleno = 26 (0x1a), region = 44  ;;  %vm279_vm0 = vcmask (!%p1030_p4), 64512   ;;  %vm281_vm1 = vcmask (!%p1030_p4), 58368   ;;  %vm301_vm2 = vcmask (!%p1030_p4), 57344   ;;  %v1276_v0 = vmov (!%p1030_p4), 0.0  }
   0xf   : > { %s1045_s27 = sshll.u32 %s265_s26, 6  ;;  %280 = vst.msk [vmem:[#allocation2] sm:$0xff] (!%p1030_p4), %vm279_vm0, %v1276_v0  ;;  %283 = vst.msk [vmem:[#allocation2 + $0x10] sm:$0xff] (!%p1030_p4), %vm279_vm0, %v1276_v0 }
  0x10   : > { %s1336_s30 = scalar_lea.vmem %s1594_s0, %s1045_s27  ;;  %s1341_s10 = scalar_lea.vmem %s1599_s5, %s1045_s27  ;;  %285 = vst.msk [vmem:[#allocation2 + $0x20] sm:$0xff] (!%p1030_p4), %vm279_vm0, %v1276_v0  ;;  %287 = vst.msk [vmem:[#allocation2 + $0x30] sm:$0xff] (!%p1030_p4), %vm279_vm0, %v1276_v0 }
  0x11   : > { %289 = vst.msk [vmem:[#allocation2 + $0x40] sm:$0xff] (!%p1030_p4), %vm279_vm0, %v1276_v0  ;;  %291 = vst.msk [vmem:[#allocation2 + $0x50] sm:$0xff] (!%p1030_p4), %vm279_vm0, %v1276_v0 }
  0x12   : > { %293 = vst.msk [vmem:[#allocation2 + $0x60] sm:$0xff] (!%p1030_p4), %vm279_vm0, %v1276_v0  ;;  %295 = vst.msk [vmem:[#allocation2 + $0x70] sm:$0xff] (!%p1030_p4), %vm279_vm0, %v1276_v0 }
  0x13   : > { %297 = vst.msk [vmem:[#allocation2 + $0x80] sm:$0xff] (!%p1030_p4), %vm279_vm0, %v1276_v0  ;;  %299 = vst.msk [vmem:[#allocation2 + $0x90] sm:$0xff] (!%p1030_p4), %vm279_vm0, %v1276_v0 }
  0x14   : > { %282 = vst.msk [vmem:[#allocation2 + $0x8] sm:$0x3] (!%p1030_p4), %vm281_vm1, %v1276_v0  ;;  %284 = vst.msk [vmem:[#allocation2 + $0x18] sm:$0x3] (!%p1030_p4), %vm281_vm1, %v1276_v0 }
  0x15   : > { %286 = vst.msk [vmem:[#allocation2 + $0x28] sm:$0x3] %vm281_vm1, %v1276_v0  ;;  %288 = vst.msk [vmem:[#allocation2 + $0x38] sm:$0x3] %vm281_vm1, %v1276_v0 }
  0x16   : > { %290 = vst.msk [vmem:[#allocation2 + $0x48] sm:$0x3] %vm281_vm1, %v1276_v0  ;;  %292 = vst.msk [vmem:[#allocation2 + $0x58] sm:$0x3] %vm281_vm1, %v1276_v0 }
  0x17   : > { %294 = vst.msk [vmem:[#allocation2 + $0x68] sm:$0x3] %vm281_vm1, %v1276_v0  ;;  %296 = vst.msk [vmem:[#allocation2 + $0x78] sm:$0x3] %vm281_vm1, %v1276_v0 }
  0x18   : > { %298 = vst.msk [vmem:[#allocation2 + $0x88] sm:$0x3] %vm281_vm1, %v1276_v0  ;;  %300 = vst.msk [vmem:[#allocation2 + $0x98] sm:$0x3] %vm281_vm1, %v1276_v0 }
  0x19   : > { %302 = vst.msk [vmem:[%s1600_s6] sm:$0x1] %vm301_vm2, %v1276_v0  ;;  %303 = vst.msk [vmem:[%s1601_s7] sm:$0x1] %vm301_vm2, %v1276_v0 }
  0x1a PF: > { %v304_v1 = vld [vmem:[%s1336_s30] sm:$0xff]  ;;  %v305_v5 = vld [vmem:[%s1336_s30 + $0x8] sm:$0xff]  ;;  %vm351_vm3 = vcmask 64512   ;;  %v306_v6 = vld [vmem:[%s1336_s30 + $0x10] sm:$0xff]  ;;  %s1277_s19 = smov 16   ;;  %s1278_s20 = smov 8  }
  0x1b   : > { %v1031_v2 = vld [vmem:[%s1595_s1] ss:$0 sm:$0xff]  ;;  %v307_v8 = vld [vmem:[%s1336_s30 + $0x18] sm:$0xff]  ;;  %v309_v14 = vld [vmem:[%s1336_s30 + $0x28] sm:$0xff]  ;;  %s1279_s26 = smov 24   ;;  %s1280_s29 = smov 32  }
  0x1c   : > { %v1032_v3 = vld [vmem:[%s1596_s2] ss:$0 sm:$0xff]  ;;  %v319_v4 = vmul.f32 %v1031_v2, %v304_v1  ;;  %v320_v7 = vmul.f32 %v1031_v2, %v305_v5  ;;  %v321_v11 = vmul.f32 %v1031_v2, %v306_v6  ;;  %v322_v12 = vmul.f32 %v1031_v2, %v307_v8  ;;  %v310_v15 = vld [vmem:[%s1336_s30 + $0x30] sm:$0xff]  ;;  %v311_v16 = vld [vmem:[%s1336_s30 + $0x38] sm:$0xff]  ;;  %s1281_s9 = smov 40   ;;  %s1282_s13 = smov 48  }
  0x1d   : > { %v308_v9 = vld [vmem:[%s1336_s30 + $0x20] sm:$0xff]  ;;  %v324_v18 = vmul.f32 %v1031_v2, %v309_v14  ;;  %v325_v19 = vmul.f32 %v1031_v2, %v310_v15  ;;  %v326_v20 = vmul.f32 %v1031_v2, %v311_v16  ;;  %v1264_v55 = vld [vmem:[%s1597_s3 + $0x8] sm:$0xff]   ;;  %v1265_v59 = vld [vmem:[%s1597_s3 + $0x10] sm:$0xff]   ;;  %vm820_vm4 = vcmask 1043456   ;;  %s1283_s14 = smov 56   ;;  %s1284_s15 = smov 64  }
  0x1e   : > { %v334_v10 = vadd.f32 %v1032_v3, %v319_v4  ;;  %v323_v13 = vmul.f32 %v1031_v2, %v308_v9  ;;  %v335_v17 = vadd.f32 %v1032_v3, %v320_v7  ;;  %v336_v22 = vadd.f32 %v1032_v3, %v321_v11  ;;  %v1263_v54 = vld [vmem:[%s1597_s3] sm:$0xff]   ;;  %v1266_v63 = vld [vmem:[%s1597_s3 + $0x18] sm:$0xff]  }
  0x1f   : > { %v337_v23 = vadd.f32 %v1032_v3, %v322_v12  ;;  %v339_v26 = vadd.f32 %v1032_v3, %v324_v18  ;;  %v340_v27 = vadd.f32 %v1032_v3, %v325_v19  ;;  %v341_v28 = vadd.f32 %v1032_v3, %v326_v20  ;;  %1056 = vmatprep.subr.bf16.mxu0 %v1263_v54 }
  0x20   : > { %v342_v21 = vmax.f32 %v334_v10, 0.0  ;;  %v338_v24 = vadd.f32 %v1032_v3, %v323_v13  ;;  %v343_v25 = vmax.f32 %v335_v17, 0.0  ;;  %v344_v29 = vmax.f32 %v336_v22, 0.0  ;;  %v376_v35 = vld [vmem:[#allocation2 + $0x2] sm:$0xff]  ;;  %1074 = vmatprep.subr.bf16.mxu1 %v1263_v54  ;;  %1057 = vmatpush3.bf16.msra.mxu0 %v1263_v54  ;;  %v1267_v3 = vld [vmem:[%s1597_s3 + $0x20] ss:$0 sps:$4 sm:$0xff]  }
  0x21   : > { %v345_v30 = vmax.f32 %v337_v23, 0.0  ;;  %v347_v32 = vmax.f32 %v339_v26, 0.0  ;;  %v348_v33 = vmax.f32 %v340_v27, 0.0  ;;  %v349_v34 = vmax.f32 %v341_v28, 0.0  ;;  %v368_v36 = vld [vmem:[#allocation2 + $0x1] sm:$0xff]  ;;  %1079 = vmatpush3.bf16.msra.mxu1 %v1263_v54  ;;  %1058 = vmatprep.subr.bf16.mxu0 %v1264_v55  ;;  %v424_v28 = vld [vmem:[#allocation2 + $0x91] sm:$0xff] }
  0x22   : > { %352 = vst.msk [vmem:[#allocation2 + $0x11] sm:$0xff] %vm351_vm3, %v342_v21  ;;  %v346_v31 = vmax.f32 %v338_v24, 0.0  ;;  %353 = vst.msk [vmem:[#allocation2 + $0x21] sm:$0xff] %vm351_vm3, %v343_v25  ;;  %1075 = vmatprep.subr.bf16.mxu1 %v1264_v55  ;;  %v822_v5 = vsel %vm820_vm4, %v1267_v3, 0  ;;  %v416_v25 = vld [vmem:[#allocation2 + $0x90] sm:$0xff]  ;;  %vm697_vm5 = vcmask 130048  }
  0x23   : > { %354 = vst.msk [vmem:[#allocation2 + $0x31] sm:$0xff] %vm351_vm3, %v344_v29  ;;  %355 = vst.msk [vmem:[#allocation2 + $0x41] sm:$0xff] %vm351_vm3, %v345_v30  ;;  %v432_v30 = vld [vmem:[#allocation2 + $0x92] sm:$0xff]  ;;  %vm706_vm6 = vcmask 195584   ;;  %vm715_vm7 = vcmask 261120   ;;  %vm724_vm8 = vcmask 326656  }
  0x24   : > { %356 = vst.msk [vmem:[#allocation2 + $0x51] sm:$0xff] %vm351_vm3, %v346_v31  ;;  %357 = vst.msk [vmem:[#allocation2 + $0x61] sm:$0xff] %vm351_vm3, %v347_v32  ;;  %1059 = vmatpush3.bf16.msra.mxu0 %v1264_v55  ;;  %vm733_vm9 = vcmask 392192   ;;  %vm742_vm10 = vcmask 457728   ;;  %vm751_vm11 = vcmask 523264   ;;  %vm807_vm12 = vcmask 588800  }
  0x25   : > { %358 = vst.msk [vmem:[#allocation2 + $0x71] sm:$0xff] %vm351_vm3, %v348_v33  ;;  %359 = vst.msk [vmem:[#allocation2 + $0x81] sm:$0xff] %vm351_vm3, %v349_v34  ;;  %1080 = vmatpush3.bf16.msra.mxu1 %v1264_v55  ;;  %1060 = vmatprep.subr.bf16.mxu0 %v1265_v59  ;;  %vm912_vm13 = vcmask 57344  }
  0x26   : > { %1076 = vmatprep.subr.bf16.mxu1 %v1265_v59 }
  0x28   : > { %1061 = vmatpush3.bf16.msra.mxu0 %v1265_v59 }
  0x29   : > { %v377_v37 = vld [vmem:[#allocation2 + $0x12] sm:$0xff]  ;;  %v378_v41 = vld [vmem:[#allocation2 + $0x22] sm:$0xff]  ;;  %1081 = vmatpush3.bf16.msra.mxu1 %v1265_v59  ;;  %1062 = vmatprep.subr.bf16.mxu0 %v1266_v63 }
  0x2a   : > { %v369_v38 = vld [vmem:[#allocation2 + $0x11] sm:$0xff]  ;;  %v1113_v39 = vpack.i.bf16 %v377_v37, %v376_v35  ;;  %v370_v42 = vld [vmem:[#allocation2 + $0x21] sm:$0xff]  ;;  %v1143_v61 = vpack.i.bf16 %v378_v41, %v377_v37  ;;  %1077 = vmatprep.subr.bf16.mxu1 %v1266_v63 }
  0x2b   : > { %v1103_v40 = vpack.i.bf16 %v369_v38, %v368_v36  ;;  %v379_v43 = vld [vmem:[#allocation2 + $0x32] sm:$0xff]  ;;  %v1391_v49 = vld [vmem:[#allocation2 + $0x40] sm:$0xff]  ;;  %v1133_v57 = vpack.i.bf16 %v370_v42, %v369_v38 }
  0x2c   : > { %v371_v44 = vld [vmem:[#allocation2 + $0x31] sm:$0xff]  ;;  %1114 = vrot.lane.b32.xlu1 %v1113_v39, %s1277_s19  ;;  %v1385_v45 = vpack.i.bf16 %v379_v43, %v378_v41  ;;  %v1393_v50 = vld [vmem:[#allocation2 + $0x20] sm:$0xff]  ;;  %1063 = vmatpush3.bf16.msra.mxu0 %v1266_v63 }
  0x2d   : > { %1104 = vrot.lane.b32.xlu0 %v1103_v40, %s1278_s20  ;;  %v1108_v46 = vpack.i.bf16 %v371_v44, %v370_v42  ;;  %v1387_v47 = vld [vmem:[#allocation2 + $0x10] sm:$0xff]  ;;  %v395_v53 = vld [vmem:[#allocation2 + $0x41] sm:$0xff]  ;;  %1082 = vmatpush3.bf16.msra.mxu1 %v1266_v63 }
  0x2e   : > { %v1389_v48 = vld [vmem:[#allocation2 + $0x30] sm:$0xff]  ;;  %v1123_v52 = vpack.i.bf16 %v1393_v50, %v1387_v47  ;;  %v1138_v56 = vpack.i.bf16 %v395_v53, %v371_v44  ;;  %v403_v58 = vld [vmem:[#allocation2 + $0x42] sm:$0xff]  ;;  %1084 = vmatprep.subr.msk.bf16.mxu0 %vm820_vm4, %v1267_v3  ;;  %1085 = vmatprep.subr.msk.bf16.mxu1 %vm820_vm4, %v1267_v3 }
  0x2f   : > { %v1128_v51 = vpack.i.bf16 %v1391_v49, %v1389_v48  ;;  %v1148_v60 = vpack.i.bf16 %v403_v58, %v379_v43  ;;  %v1415_v62 = vld [vmem:[#allocation2 + $0x50] sm:$0xff]  ;;  %v1153_v1 = vpack.i.bf16 %v1389_v48, %v1393_v50  ;;  %v374_v6 = vld [vmem:[#allocation2 + $0x61] sm:$0xff] }
  0x30   : > { %1119 = vrot.lane.b32.xlu1 %v1385_v45, %s1277_s19  ;;  %v1158_v0 = vpack.i.bf16 %v1415_v62, %v1391_v49  ;;  %v420_v2 = vld [vmem:[#allocation2 + $0x51] sm:$0xff]  ;;  %1065 = vmatpush3.bf16.msra.mxu0 %v822_v5  ;;  %v382_v11 = vld [vmem:[#allocation2 + $0x62] sm:$0xff] }
  0x31   : > { %1109 = vrot.lane.b32.xlu0 %v1108_v46, %s1278_s20  ;;  %v1168_v4 = vpack.i.bf16 %v420_v2, %v395_v53  ;;  %v375_v7 = vld [vmem:[#allocation2 + $0x71] sm:$0xff]  ;;  %1083 = vmatpush3.bf16.msra.mxu1 %v822_v5  ;;  %v391_v15 = vld [vmem:[#allocation2 + $0x80] sm:$0xff]  ;;  %v1213_v21 = vpack.i.bf16 %v374_v6, %v420_v2 }
  0x32   : > { %v428_v8 = vld [vmem:[#allocation2 + $0x52] sm:$0xff]  ;;  %v1188_v9 = vpack.i.bf16 %v375_v7, %v374_v6  ;;  %v1440_v16 = vld [vmem:[#allocation2 + $0x60] sm:$0xff]  ;;  %v1238_v26 = vpack.i.bf16 %v416_v25, %v391_v15 }
  0x33   : > { %v1183_v10 = vpack.i.bf16 %v428_v8, %v403_v58  ;;  %v383_v12 = vld [vmem:[#allocation2 + $0x72] sm:$0xff]  ;;  %v1203_v18 = vpack.i.bf16 %v1440_v16, %v1415_v62  ;;  %v399_v19 = vld [vmem:[#allocation2 + $0x81] sm:$0xff]  ;;  %v1223_v24 = vpack.i.bf16 %v382_v11, %v428_v8 }
  0x34   : > { %1129 = vrot.lane.b32.xlu1 %v1128_v51, %s1279_s26  ;;  %v1198_v13 = vpack.i.bf16 %v383_v12, %v382_v11  ;;  %v1438_v14 = vld [vmem:[#allocation2 + $0x70] sm:$0xff]  ;;  %v1218_v20 = vpack.i.bf16 %v399_v19, %v375_v7  ;;  %v407_v22 = vld [vmem:[#allocation2 + $0x82] sm:$0xff]  ;;  %v1248_v29 = vpack.i.bf16 %v424_v28, %v399_v19 }
  0x35   : > { %1124 = vrot.lane.b32.xlu0 %v1123_v52, %s1279_s26  ;;  %v1208_v17 = vpack.i.bf16 %v391_v15, %v1438_v14  ;;  %v1228_v23 = vpack.i.bf16 %v407_v22, %v383_v12  ;;  %v1233_v27 = vpack.i.bf16 %v1438_v14, %v1440_v16  ;;  %v1258_v31 = vpack.i.bf16 %v432_v30, %v407_v22  ;;  %v360_v42 = vld [vmem:[#allocation2] sm:$0xff] }
  0x38   : > { %1139 = vrot.lane.b32.xlu1 %v1138_v56, %s1280_s29 }
  0x39   : > { %1134 = vrot.lane.b32.xlu0 %v1133_v57, %s1280_s29 }
  0x3c   : > { %1149 = vrot.lane.b32.xlu1 %v1148_v60, %s1281_s9 }
  0x3d   : > { %1144 = vrot.lane.b32.xlu0 %v1143_v61, %s1281_s9 }
  0x40   : > { %1159 = vrot.lane.b32.xlu1 %v1158_v0, %s1282_s13 }
  0x41   : > { %1154 = vrot.lane.b32.xlu0 %v1153_v1, %s1282_s13 }
  0x44   : > { %1169 = vrot.lane.b32.xlu1 %v1168_v4, %s1283_s14 }
  0x45   : > { %1164 = vrot.lane.b32.xlu0 %v1108_v46, %s1283_s14 }
  0x48   : > { %1179 = vrot.lane.b32.xlu1 %v1168_v4, %s1278_s20 }
  0x49   : > { %1174 = vrot.lane.b32.xlu0 %v1385_v45, %s1284_s15 }
  0x4c   : > { %1189 = vrot.lane.b32.xlu1 %v1188_v9, %s1278_s20 }
  0x4d   : > { %1184 = vrot.lane.b32.xlu0 %v1183_v10, %s1284_s15 }
  0x50   : > { %1199 = vrot.lane.b32.xlu1 %v1198_v13, %s1277_s19 }
  0x51   : > { %1194 = vrot.lane.b32.xlu0 %v1183_v10, %s1277_s19 }
  0x54   : > { %1209 = vrot.lane.b32.xlu1 %v1208_v17, %s1279_s26 }
  0x55   : > { %1204 = vrot.lane.b32.xlu0 %v1203_v18, %s1279_s26 }
  0x58   : > { %1219 = vrot.lane.b32.xlu1 %v1218_v20, %s1280_s29 }
  0x59   : > { %1214 = vrot.lane.b32.xlu0 %v1213_v21, %s1280_s29 }
  0x5c   : > { %1229 = vrot.lane.b32.xlu1 %v1228_v23, %s1281_s9 }
  0x5d   : > { %1224 = vrot.lane.b32.xlu0 %v1223_v24, %s1281_s9 }
  0x60   : > { %1239 = vrot.lane.b32.xlu1 %v1238_v26, %s1282_s13 }
  0x61   : > { %1234 = vrot.lane.b32.xlu0 %v1233_v27, %s1282_s13 }
  0x64   : > { %1249 = vrot.lane.b32.xlu1 %v1248_v29, %s1283_s14 }
  0x65   : > { %1244 = vrot.lane.b32.xlu0 %v1188_v9, %s1283_s14 }
  0x68   : > { %1259 = vrot.lane.b32.xlu1 %v1258_v31, %s1284_s15 }
  0x69   : > { %1254 = vrot.lane.b32.xlu0 %v1198_v13, %s1284_s15 }
  0x9e   : > { %v1115_v32 = vpop.permute.xlu1 %1114 }
  0x9f   : > { %v1105_v33 = vpop.permute.xlu0 %1104  ;;  %v1117_v51 = vunpack.i.h.bf16 %v1115_v32  ;;  %v1116_v52 = vunpack.i.l.bf16 %v1115_v32 }
  0xa0   : > { %v1107_v40 = vunpack.i.h.bf16 %v1105_v33  ;;  %v1106_v41 = vunpack.i.l.bf16 %v1105_v33 }
  0xa2   : > { %v1120_v34 = vpop.permute.xlu1 %1119  ;;  %v689_v53 = vsel %vm351_vm3, %v360_v42, %v1106_v41  ;;  %v690_v54 = vsel %vm351_vm3, %v1387_v47, %v1107_v40 }
  0xa3   : > { %v1110_v35 = vpop.permute.xlu0 %1109  ;;  %v1122_v55 = vunpack.i.h.bf16 %v1120_v34  ;;  %v1121_v56 = vunpack.i.l.bf16 %v1120_v34  ;;  %v698_v2 = vsel %vm697_vm5, %v689_v53, %v1116_v52  ;;  %v699_v47 = vsel %vm697_vm5, %v690_v54, %v1117_v51 }
  0xa4   : > { %v1112_v43 = vunpack.i.h.bf16 %v1110_v35  ;;  %v1111_v44 = vunpack.i.l.bf16 %v1110_v35 }
  0xa6   : > { %v1130_v36 = vpop.permute.xlu1 %1129  ;;  %v692_v57 = vsel %vm351_vm3, %v1389_v48, %v1112_v43  ;;  %v691_v58 = vsel %vm351_vm3, %v1393_v50, %v1111_v44 }
  0xa7   : > { %v1125_v37 = vpop.permute.xlu0 %1124  ;;  %v1132_v59 = vunpack.i.h.bf16 %v1130_v36  ;;  %v1131_v60 = vunpack.i.l.bf16 %v1130_v36  ;;  %v700_v3 = vsel %vm697_vm5, %v691_v58, %v1121_v56  ;;  %v701_v48 = vsel %vm697_vm5, %v692_v57, %v1122_v55 }
  0xa8   : > { %v1127_v0 = vunpack.i.h.bf16 %v1125_v37  ;;  %v1126_v1 = vunpack.i.l.bf16 %v1125_v37 }
  0xa9   : > { %v709_v5 = vsel %vm706_vm6, %v700_v3, %v1131_v60  ;;  %v710_v6 = vsel %vm706_vm6, %v701_v48, %v1132_v59 }
  0xaa   : > { %v1461_v38 = vpop.permute.xlu1 %1139  ;;  %v707_v11 = vsel %vm706_vm6, %v698_v2, %v1126_v1  ;;  %v708_v12 = vsel %vm706_vm6, %v699_v47, %v1127_v0 }
  0xab   : > { %v1135_v39 = vpop.permute.xlu0 %1134  ;;  %v1142_v17 = vunpack.i.h.bf16 %v1461_v38  ;;  %v1141_v18 = vunpack.i.l.bf16 %v1461_v38 }
  0xac   : > { %v1137_v4 = vunpack.i.h.bf16 %v1135_v39  ;;  %v1136_v50 = vunpack.i.l.bf16 %v1135_v39 }
  0xad   : > { %v718_v39 = vsel %vm715_vm7, %v709_v5, %v1141_v18  ;;  %v719_v40 = vsel %vm715_vm7, %v710_v6, %v1142_v17 }
  0xae   : > { %v1463_v45 = vpop.permute.xlu1 %1149  ;;  %v716_v21 = vsel %vm715_vm7, %v707_v11, %v1136_v50  ;;  %v717_v22 = vsel %vm715_vm7, %v708_v12, %v1137_v4 }
  0xaf   : > { %v1145_v46 = vpop.permute.xlu0 %1144  ;;  %v1152_v23 = vunpack.i.h.bf16 %v1463_v45  ;;  %v1151_v24 = vunpack.i.l.bf16 %v1463_v45 }
  0xb0   : > { %v1147_v7 = vunpack.i.h.bf16 %v1145_v46  ;;  %v1146_v8 = vunpack.i.l.bf16 %v1145_v46 }
  0xb1   : > { %v727_v43 = vsel %vm724_vm8, %v718_v39, %v1151_v24  ;;  %v728_v44 = vsel %vm724_vm8, %v719_v40, %v1152_v23 }
  0xb2   : > { %v1160_v61 = vpop.permute.xlu1 %1159  ;;  %v725_v25 = vsel %vm724_vm8, %v716_v21, %v1146_v8  ;;  %v726_v26 = vsel %vm724_vm8, %v717_v22, %v1147_v7 }
  0xb3   : > { %v1155_v63 = vpop.permute.xlu0 %1154  ;;  %v1162_v27 = vunpack.i.h.bf16 %v1160_v61  ;;  %v1161_v28 = vunpack.i.l.bf16 %v1160_v61 }
  0xb4   : > { %v1157_v13 = vunpack.i.h.bf16 %v1155_v63  ;;  %v1156_v15 = vunpack.i.l.bf16 %v1155_v63 }
  0xb5   : > { %v736_v52 = vsel %vm733_vm9, %v727_v43, %v1161_v28  ;;  %v737_v53 = vsel %vm733_vm9, %v728_v44, %v1162_v27 }
  0xb6   : > { %v1170_v9 = vpop.permute.xlu1 %1169  ;;  %v734_v31 = vsel %vm733_vm9, %v725_v25, %v1156_v15  ;;  %v735_v32 = vsel %vm733_vm9, %v726_v26, %v1157_v13 }
  0xb7   : > { %v1165_v10 = vpop.permute.xlu0 %1164  ;;  %v1172_v35 = vunpack.i.h.bf16 %v1170_v9  ;;  %v1171_v36 = vunpack.i.l.bf16 %v1170_v9 }
  0xb8   : > { %v1167_v19 = vunpack.i.h.bf16 %v1165_v10  ;;  %v1166_v20 = vunpack.i.l.bf16 %v1165_v10 }
  0xb9   : > { %v745_v56 = vsel %vm742_vm10, %v736_v52, %v1171_v36  ;;  %v746_v57 = vsel %vm742_vm10, %v737_v53, %v1172_v35 }
  0xba   : > { %v1180_v29 = vpop.permute.xlu1 %1179  ;;  %v743_v37 = vsel %vm742_vm10, %v734_v31, %v1166_v20  ;;  %v744_v38 = vsel %vm742_vm10, %v735_v32, %v1167_v19 }
  0xbb   : > { %v1175_v30 = vpop.permute.xlu0 %1174  ;;  %v1182_v3 = vunpack.i.h.bf16 %v1180_v29  ;;  %v1181_v48 = vunpack.i.l.bf16 %v1180_v29 }
  0xbc   : > { %v1177_v33 = vunpack.i.h.bf16 %v1175_v30  ;;  %v1176_v34 = vunpack.i.l.bf16 %v1175_v30 }
  0xbd   : > { %v694_v17 = vsel %vm351_vm3, %v1415_v62, %v1182_v3  ;;  %v693_v18 = vsel %vm351_vm3, %v1391_v49, %v1181_v48 }
  0xbe   : > { %v752_v41 = vsel %vm751_vm11, %v743_v37, %v1176_v34  ;;  %v753_v42 = vsel %vm751_vm11, %v744_v38, %v1177_v33  ;;  %v1190_v45 = vpop.permute.xlu1 %1189 }
  0xbf   : > { %v1185_v46 = vpop.permute.xlu0 %1184  ;;  %v760_v51 = vpack.c.bf16 %v753_v42, %v752_v41  ;;  %v1192_v4 = vunpack.i.h.bf16 %v1190_v45  ;;  %v1191_v50 = vunpack.i.l.bf16 %v1190_v45 }
  0xc0   : > { %v1187_v54 = vunpack.i.h.bf16 %v1185_v46  ;;  %v1186_v55 = vunpack.i.l.bf16 %v1185_v46 }
  0xc1   : > { %1066 = vmatprep.mubr.msk.bf16.mxu0 %vm807_vm12, %v760_v51  ;;  %v696_v19 = vsel %vm351_vm3, %v1438_v14, %v1192_v4  ;;  %v695_v20 = vsel %vm351_vm3, %v1440_v16, %v1191_v50 }
  0xc2   : > { %v754_v58 = vsel %vm751_vm11, %v745_v56, %v1186_v55  ;;  %v755_v59 = vsel %vm751_vm11, %v746_v57, %v1187_v54  ;;  %v1200_v61 = vpop.permute.xlu1 %1199 }
  0xc3   : > { %v761_v60 = vpack.c.bf16 %v755_v59, %v754_v58  ;;  %v1195_v63 = vpop.permute.xlu0 %1194  ;;  %v1202_v5 = vunpack.i.h.bf16 %v1200_v61  ;;  %v1201_v6 = vunpack.i.l.bf16 %v1200_v61 }
  0xc4   : > { %v1197_v7 = vunpack.i.h.bf16 %v1195_v63  ;;  %v1196_v8 = vunpack.i.l.bf16 %v1195_v63 }
  0xc5   : > { %1067 = vmatmul.mubr.msk.bf16.vlgmr.msra.gmra.mrb[0].mxu0 %vm807_vm12, %v761_v60  ;;  %v704_v21 = vsel %vm697_vm5, %v695_v20, %v1201_v6  ;;  %v705_v22 = vsel %vm697_vm5, %v696_v19, %v1202_v5 }
  0xc6   : > { %v1210_v0 = vpop.permute.xlu1 %1209  ;;  %v703_v23 = vsel %vm697_vm5, %v694_v17, %v1197_v7  ;;  %v702_v24 = vsel %vm697_vm5, %v693_v18, %v1196_v8 }
  0xc7   : > { %v1205_v1 = vpop.permute.xlu0 %1204  ;;  %v1212_v11 = vunpack.i.h.bf16 %v1210_v0  ;;  %v1211_v12 = vunpack.i.l.bf16 %v1210_v0 }
  0xc8   : > { %v1207_v13 = vunpack.i.h.bf16 %v1205_v1  ;;  %v1206_v15 = vunpack.i.l.bf16 %v1205_v1 }
  0xc9   : > { %v713_v29 = vsel %vm706_vm6, %v704_v21, %v1211_v12  ;;  %v714_v14 = vsel %vm706_vm6, %v705_v22, %v1212_v11  ;;  %v1033_v11 = vld [vmem:[%s1598_s4] ss:$0 sm:$0xff] }
  0xca   : > { %v1220_v2 = vpop.permute.xlu1 %1219  ;;  %v711_v16 = vsel %vm706_vm6, %v702_v24, %v1206_v15  ;;  %v712_v30 = vsel %vm706_vm6, %v703_v23, %v1207_v13 }
  0xcb   : > { %v1215_v47 = vpop.permute.xlu0 %1214  ;;  %v1222_v62 = vunpack.i.h.bf16 %v1220_v2  ;;  %v1221_v27 = vunpack.i.l.bf16 %v1220_v2 }
  0xcc   : > { %v1217_v28 = vunpack.i.h.bf16 %v1215_v47  ;;  %v1216_v49 = vunpack.i.l.bf16 %v1215_v47 }
  0xcd   : > { %v722_v41 = vsel %vm715_vm7, %v713_v29, %v1221_v27  ;;  %v723_v42 = vsel %vm715_vm7, %v714_v14, %v1222_v62 }
  0xce   : > { %v1230_v9 = vpop.permute.xlu1 %1229  ;;  %v720_v43 = vsel %vm715_vm7, %v711_v16, %v1216_v49  ;;  %v721_v44 = vsel %vm715_vm7, %v712_v30, %v1217_v28 }
  0xcf   : > { %v1225_v10 = vpop.permute.xlu0 %1224  ;;  %v1232_v31 = vunpack.i.h.bf16 %v1230_v9  ;;  %v1231_v32 = vunpack.i.l.bf16 %v1230_v9 }
  0xd0   : > { %v1227_v33 = vunpack.i.h.bf16 %v1225_v10  ;;  %v1226_v34 = vunpack.i.l.bf16 %v1225_v10 }
  0xd1   : > { %v731_v53 = vsel %vm724_vm8, %v722_v41, %v1231_v32  ;;  %v732_v54 = vsel %vm724_vm8, %v723_v42, %v1232_v31 }
  0xd2   : > { %v1240_v25 = vpop.permute.xlu1 %1239  ;;  %v729_v55 = vsel %vm724_vm8, %v720_v43, %v1226_v34  ;;  %v730_v56 = vsel %vm724_vm8, %v721_v44, %v1227_v33 }
  0xd3   : > { %v1235_v26 = vpop.permute.xlu0 %1234  ;;  %v1242_v35 = vunpack.i.h.bf16 %v1240_v25  ;;  %v1241_v36 = vunpack.i.l.bf16 %v1240_v25 }
  0xd4   : > { %v1237_v37 = vunpack.i.h.bf16 %v1235_v26  ;;  %v1236_v38 = vunpack.i.l.bf16 %v1235_v26 }
  0xd5   : > { %v740_v57 = vsel %vm733_vm9, %v731_v53, %v1241_v36  ;;  %v741_v58 = vsel %vm733_vm9, %v732_v54, %v1242_v35 }
  0xd6   : > { %v1250_v39 = vpop.permute.xlu1 %1249  ;;  %v738_v59 = vsel %vm733_vm9, %v729_v55, %v1236_v38  ;;  %v739_v60 = vsel %vm733_vm9, %v730_v56, %v1237_v37 }
  0xd7   : > { %v1245_v40 = vpop.permute.xlu0 %1244  ;;  %v1252_v45 = vunpack.i.h.bf16 %v1250_v39  ;;  %v1251_v46 = vunpack.i.l.bf16 %v1250_v39 }
  0xd8   : > { %v1247_v51 = vunpack.i.h.bf16 %v1245_v40  ;;  %v1246_v52 = vunpack.i.l.bf16 %v1245_v40 }
  0xd9   : > { %v749_v3 = vsel %vm742_vm10, %v740_v57, %v1251_v46  ;;  %v750_v48 = vsel %vm742_vm10, %v741_v58, %v1252_v45 }
  0xda   : > { %v1260_v61 = vpop.permute.xlu1 %1259  ;;  %v747_v4 = vsel %vm742_vm10, %v738_v59, %v1246_v52  ;;  %v748_v50 = vsel %vm742_vm10, %v739_v60, %v1247_v51 }
  0xdb   : > { %v1255_v63 = vpop.permute.xlu0 %1254  ;;  %v1262_v0 = vunpack.i.h.bf16 %v1260_v61  ;;  %v1261_v1 = vunpack.i.l.bf16 %v1260_v61 }
  0xdc   : > { %v1257_v2 = vunpack.i.h.bf16 %v1255_v63  ;;  %v1256_v47 = vunpack.i.l.bf16 %v1255_v63 }
  0xdd   : > { %v758_v5 = vsel %vm751_vm11, %v749_v3, %v1261_v1  ;;  %v759_v6 = vsel %vm751_vm11, %v750_v48, %v1262_v0 }
  0xde   : > { %v756_v7 = vsel %vm751_vm11, %v747_v4, %v1256_v47  ;;  %v757_v8 = vsel %vm751_vm11, %v748_v50, %v1257_v2  ;;  %v763_v9 = vpack.c.bf16 %v759_v6, %v758_v5 }
  0xdf   : > { %v762_v10 = vpack.c.bf16 %v757_v8, %v756_v7 }
  0xe1   : > { %1070 = vmatprep.mubr.msk.bf16.mxu1 %vm807_vm12, %v762_v10 }
  0xe2   : > { %1071 = vmatmul.mubr.msk.bf16.vlgmr.msra.gmra.mrb[0].mxu1 %vm807_vm12, %v763_v9 }
 0x198   : > { %v1068_v12 = vpop.f32.mrb[0].mxu0 }
 0x199   : > { %v867_v13 = vadd.f32 %v1068_v12, %v1033_v11  ;;  %v858_v15 = vpop.f32.mrb[1].mxu0 }
 0x19a   : > { %v859_v17 = vadd.f32 %v1033_v11, %v858_v15  ;;  %v1069_v18 = vpop.f32.mrb[2].mxu0  ;;  %v914_v15 = vld [vmem:[%s1601_s7] sm:$0x1] }
 0x19b   : > { %948 = vst.msk [vmem:[%s1341_s10 + $0x10] sm:$0xff] %vm351_vm3, %v867_v13  ;;  %v870_v19 = vadd.f32 %v1069_v18, %v1033_v11  ;;  %v861_v20 = vpop.f32.mrb[3].mxu0  ;;  %v917_v23 = vmul.f32 %v867_v13, %v867_v13  ;;  %v893_v27 = vsel %vm351_vm3, %v867_v13, 0.0 }
 0x19c   : > { %v915_v21 = vmul.f32 %v859_v17, %v859_v17  ;;  %946 = vst.msk [vmem:[%s1341_s10] sm:$0xff] %vm351_vm3, %v859_v17  ;;  %v862_v22 = vadd.f32 %v1033_v11, %v861_v20  ;;  %v890_v24 = vsel %vm351_vm3, %v859_v17, 0.0 }
 0x19d   : > { %949 = vst.msk [vmem:[%s1341_s10 + $0x18] sm:$0xff] %vm351_vm3, %v870_v19  ;;  %v918_v49 = vmul.f32 %v870_v19, %v870_v19  ;;  %v926_v30 = vsel %vm351_vm3, %v917_v23, 0.0  ;;  %v895_v31 = vsel %vm351_vm3, %v870_v19, 0.0 }
 0x19e   : > { %v891_v25 = vsel %vm351_vm3, %v862_v22, 0.0  ;;  %v916_v26 = vmul.f32 %v862_v22, %v862_v22  ;;  %947 = vst.msk [vmem:[%s1341_s10 + $0x8] sm:$0xff] %vm351_vm3, %v862_v22  ;;  %v923_v28 = vsel %vm351_vm3, %v915_v21, 0.0 }
 0x19f   : > { %v892_v62 = vadd.f32 %v891_v25, %v890_v24  ;;  %v928_v34 = vsel %vm351_vm3, %v918_v49, 0.0 }
 0x1a0   : > { %v924_v29 = vsel %vm351_vm3, %v916_v26, 0.0 }
 0x1a1   : > { %v894_v14 = vadd.f32 %v893_v27, %v892_v62  ;;  %v925_v16 = vadd.f32 %v924_v29, %v923_v28 }
 0x1a3   : > { %v927_v32 = vadd.f32 %v926_v30, %v925_v16  ;;  %v896_v33 = vadd.f32 %v895_v31, %v894_v14 }
 0x1a5   : > { %v929_v35 = vadd.f32 %v928_v34, %v927_v32 }
 0x1b5   : > { %v1072_v36 = vpop.f32.mrb[0].mxu1 }
 0x1b6   : > { %v883_v37 = vadd.f32 %v1072_v36, %v1033_v11  ;;  %v874_v38 = vpop.f32.mrb[1].mxu1 }
 0x1b7   : > { %v875_v39 = vadd.f32 %v1033_v11, %v874_v38  ;;  %v1073_v40 = vpop.f32.mrb[2].mxu1 }
 0x1b8   : > { %952 = vst.msk [vmem:[%s1341_s10 + $0x30] sm:$0xff] %vm351_vm3, %v883_v37  ;;  %v886_v41 = vadd.f32 %v1073_v40, %v1033_v11  ;;  %v877_v42 = vpop.f32.mrb[3].mxu1  ;;  %v921_v51 = vmul.f32 %v883_v37, %v883_v37  ;;  %v901_v57 = vsel %vm351_vm3, %v883_v37, 0.0 }
 0x1b9   : > { %v897_v43 = vsel %vm351_vm3, %v875_v39, 0.0  ;;  %v919_v44 = vmul.f32 %v875_v39, %v875_v39  ;;  %950 = vst.msk [vmem:[%s1341_s10 + $0x20] sm:$0xff] %vm351_vm3, %v875_v39  ;;  %v878_v45 = vadd.f32 %v1033_v11, %v877_v42  ;;  %v889_v11 = vld [vmem:[%s1600_s6] sm:$0x1] }
 0x1ba   : > { %v898_v46 = vadd.f32 %v897_v43, %v896_v33  ;;  %953 = vst.msk [vmem:[%s1341_s10 + $0x38] sm:$0xff] %vm351_vm3, %v886_v41  ;;  %v922_v58 = vmul.f32 %v886_v41, %v886_v41  ;;  %v934_v63 = vsel %vm351_vm3, %v921_v51, 0.0  ;;  %v903_v0 = vsel %vm351_vm3, %v886_v41, 0.0 }
 0x1bb   : > { %v930_v52 = vsel %vm351_vm3, %v919_v44, 0.0  ;;  %v899_v53 = vsel %vm351_vm3, %v878_v45, 0.0  ;;  %v920_v54 = vmul.f32 %v878_v45, %v878_v45  ;;  %951 = vst.msk [vmem:[%s1341_s10 + $0x28] sm:$0xff] %vm351_vm3, %v878_v45 }
 0x1bc   : > { %v931_v55 = vadd.f32 %v930_v52, %v929_v35  ;;  %v900_v56 = vadd.f32 %v899_v53, %v898_v46  ;;  %v936_v47 = vsel %vm351_vm3, %v922_v58, 0.0 }
 0x1bd   : > { %v932_v59 = vsel %vm351_vm3, %v920_v54, 0.0 }
 0x1be   : > { %v902_v60 = vadd.f32 %v901_v57, %v900_v56  ;;  %v933_v61 = vadd.f32 %v932_v59, %v931_v55 }
 0x1c0   : > { %v904_v1 = vadd.f32 %v903_v0, %v902_v60  ;;  %v935_v2 = vadd.f32 %v934_v63, %v933_v61 }
 0x1c2   : > { %v905_v3 = vrot.slane %v904_v1, 4  ;;  %v937_v48 = vadd.f32 %v936_v47, %v935_v2 }
 0x1c4   : > { %v906_v4 = vadd.f32 %v905_v3, %v904_v1  ;;  %v938_v50 = vrot.slane %v937_v48, 4 }
 0x1c6   : > { %v907_v5 = vrot.slane %v906_v4, 2  ;;  %v939_v6 = vadd.f32 %v938_v50, %v937_v48 }
 0x1c8   : > { %v908_v7 = vadd.f32 %v907_v5, %v906_v4  ;;  %v940_v8 = vrot.slane %v939_v6, 2 }
 0x1ca   : > { %v909_v9 = vrot.slane %v908_v7, 1  ;;  %v941_v10 = vadd.f32 %v940_v8, %v939_v6 }
 0x1cc   : > { %v910_v12 = vadd.f32 %v909_v9, %v908_v7  ;;  %v942_v13 = vrot.slane %v941_v10, 1 }
 0x1ce   : > { %v911_v17 = vadd.f32 %v910_v12, %v889_v11  ;;  %v943_v18 = vadd.f32 %v942_v13, %v941_v10 }
 0x1d0   : > { %913 = vst.msk [vmem:[%s1600_s6] sm:$0x1] %vm912_vm13, %v911_v17  ;;  %v944_v19 = vadd.f32 %v943_v18, %v914_v15 }
 0x1d2   : > { %945 = vst.msk [vmem:[%s1601_s7] sm:$0x1] %vm912_vm13, %v944_v19 }
 0x1d3 PF: > { %s18_s24 = sadd.s32 1, %s1274_s24  }
 0x1d4   : > { %p15_p5 = scmp.ge.s32.totalorder %s18_s24, 4  }
 0x1d6   :  { %17 = sbr.rel (!%p15_p5) target bundleno = 1 (0x1), region = 92 }

</bundles_post_ra>
